<compile_context>
chip_gen: v5e
topology: v5e:2x2
jax: 0.10.0
libtpu: 0.0.40
codegen_flags: <defaults>
</compile_context>

<pallas_src>
import math

import jax
import jax.numpy as jnp
from jax import lax
from jax.experimental import pallas as pl
from jax.experimental.pallas import tpu as pltpu


NEG_INF = -1e30   # finite stand-in for -inf in the additive attention mask
LN_EPS = 1e-5     # nn.LayerNorm default eps
FF_CHUNK = 512    # chunk width over the 2048-wide feed-forward dimension


# ------------------------- constant builders (run once at setup) -------------------------

def build_positional_encoding(d_model: int, max_len: int, dtype=jnp.float32) -> jnp.ndarray:
    """PyTorch PositionalEncoding buffer, shape (max_len, d_model); sin even cols, cos odd."""
    assert d_model % 2 == 0, "interleaved sin/cos PE requires even d_model"
    position = jnp.arange(max_len, dtype=jnp.float32)[:, None]                      # (L, 1)
    div_term = jnp.exp(
        jnp.arange(0, d_model, 2, dtype=jnp.float32) * (-math.log(10000.0) / d_model)
    )                                                                                # (D/2,)
    ang = position * div_term                                                        # (L, D/2)
    pe = jnp.stack([jnp.sin(ang), jnp.cos(ang)], axis=-1).reshape(max_len, d_model)
    return pe.astype(dtype)


def build_causal_mask(sz: int, dtype=jnp.float32) -> jnp.ndarray:
    """_generate_square_subsequent_mask: 0 on/below diagonal, -inf above (additive)."""
    r = jnp.arange(sz)
    return jnp.where(r[None, :] > r[:, None], NEG_INF, 0.0).astype(dtype)


def build_rows_mask(S: int, B: int, dtype=jnp.float32) -> jnp.ndarray:
    """(S*B, S*B) additive mask on flattened rows r = s*B + b.

    Row r may attend to column c iff they belong to the same batch element AND the
    key position is not in the future (causal). Cross-batch entries get NEG_INF, so a
    single big softmax+matmul reproduces per-batch attention exactly.
    """
    r = jnp.arange(S * B)
    s, b = r // B, r % B
    ok = (b[:, None] == b[None, :]) & (s[None, :] <= s[:, None])
    return jnp.where(ok, 0.0, NEG_INF).astype(dtype)


def prepare_inputs(params: dict, pe_table: jnp.ndarray, S: int, B: int):
    """One-time param prep: fused+scaled QKV weight, bf16 matmul weights, pe rows, mask."""
    D = params["w3"].shape[1]
    scale = 1.0 / math.sqrt(D)
    bf16 = jnp.bfloat16

    wqkv = jnp.concatenate(
        [params["wq"] * scale, params["wk"], params["wv"]], axis=1).astype(bf16)     # (D, 3D)
    bqkv = jnp.concatenate(
        [params["bq"] * scale, params["bk"], params["bv"]], axis=1).astype(jnp.float32)

    weights = (
        params["w1"].astype(bf16), params["b1"],
        params["w2"].astype(bf16), params["b2"],
        params["w3"].astype(bf16), params["b3"],
        wqkv, bqkv,
        params["wo"].astype(bf16), params["bo"],
        params["g1"], params["be1"],
        params["wf1"].astype(bf16), params["bf1"],
        params["wf2"].astype(bf16), params["bf2"],
        params["g2"], params["be2"],
    )
    pe_rows = jnp.repeat(pe_table[:S].astype(jnp.float32), B, axis=0)                # (S*B, D)
    mask_rows = build_rows_mask(S, B)                                                # (S*B, S*B)
    return pe_rows, mask_rows, weights


# --------------------------------------- kernel ---------------------------------------

def _transam_kernel(
    x_ref, pe_ref, mask_ref,
    w1_ref, b1_ref, w2_ref, b2_ref, w3_ref, b3_ref,
    wqkv_ref, bqkv_ref, wo_ref, bo_ref,
    g1_ref, be1_ref,
    wf1_ref, bf1_ref, wf2_ref, bf2_ref,
    g2_ref, be2_ref,
    o_ref,
):
    f32, bf16 = jnp.float32, jnp.bfloat16
    R, D = o_ref.shape                                               # rows = S*B, d_model

    def mm(a, w):                                                    # bf16 MXU dot, f32 acc
        return jnp.dot(a.astype(bf16), w, preferred_element_type=f32)

    x = x_ref[...]                                                   # (R, N_STATES) f32

    # --- fc MLP: three Linear+ReLU layers on flattened rows ---
    h = jnp.maximum(mm(x, w1_ref[...]) + b1_ref[...], 0.0)
    h = jnp.maximum(mm(h, w2_ref[...]) + b2_ref[...], 0.0)
    h = jnp.maximum(mm(h, w3_ref[...]) + b3_ref[...], 0.0)

    # --- fused positional-encoding add (pe already expanded to rows) ---
    src = h + pe_ref[...]                                            # (R, D)

    # --- fused QKV projection (q columns pre-scaled by 1/sqrt(D)) ---
    qkv = mm(src, wqkv_ref[...]) + bqkv_ref[...]                     # (R, 3D)
    q = qkv[:, 0:D]
    k = qkv[:, D:2 * D]
    v = qkv[:, 2 * D:3 * D]

    # --- batch-blocked causal attention on flattened rows ---
    scores = jnp.einsum("rd,cd->rc", q, k, preferred_element_type=f32) + mask_ref[...]
    m = jnp.max(scores, axis=-1, keepdims=True)
    p = jnp.exp(scores - m)
    attn = p * pl.reciprocal(jnp.sum(p, axis=-1, keepdims=True), approx=True)
    ctx = jnp.dot(attn, v, preferred_element_type=f32)               # (R, D)
    attn_out = mm(ctx, wo_ref[...]) + bo_ref[...]

    # --- residual + LayerNorm 1 (dropout disabled: eval forward) ---
    y = src + attn_out
    mu = jnp.mean(y, axis=-1, keepdims=True)
    var = jnp.mean((y - mu) ** 2, axis=-1, keepdims=True)
    y = (y - mu) * lax.rsqrt(var + LN_EPS) * g1_ref[...] + be1_ref[...]

    # --- feed-forward (ReLU), chunked over the 2048 dim with an on-the-fly accumulator ---
    y16 = y.astype(bf16)
    acc = jnp.zeros((R, D), f32)
    d_ff = wf1_ref.shape[1]
    for c in range(0, d_ff, FF_CHUNK):
        fchunk = jnp.maximum(
            jnp.dot(y16, wf1_ref[:, c:c + FF_CHUNK], preferred_element_type=f32)
            + bf1_ref[:, c:c + FF_CHUNK],
            0.0,
        )
        acc = acc + jnp.dot(fchunk.astype(bf16), wf2_ref[c:c + FF_CHUNK, :],
                            preferred_element_type=f32)

    # --- residual + LayerNorm 2 ---
    z = y + acc + bf2_ref[...]
    mu = jnp.mean(z, axis=-1, keepdims=True)
    var = jnp.mean((z - mu) ** 2, axis=-1, keepdims=True)
    z = (z - mu) * lax.rsqrt(var + LN_EPS) * g2_ref[...] + be2_ref[...]

    o_ref[...] = z.astype(o_ref.dtype)


# --------------------------------------- wrapper ---------------------------------------

def _transam_forward(src, prepared):
    """src: (S, B, N_STATES). prepared: output of prepare_inputs. Returns (S, B, d_model)."""
    pe_rows, mask_rows, weights = prepared
    S, B, N = src.shape
    R = S * B
    D = pe_rows.shape[1]

    x_rows = src.astype(jnp.float32).reshape(R, N)      # free row-major reshape, no transpose

    def full(a):
        nd = a.ndim
        return pl.BlockSpec(a.shape, lambda i: (0,) * nd)    # whole-array VMEM-resident block

    args = (x_rows, pe_rows, mask_rows) + tuple(weights)

    out_rows = pl.pallas_call(
        _transam_kernel,
        out_shape=jax.ShapeDtypeStruct((R, D), jnp.float32),
        grid=(1,),                                        # single fused invocation
        in_specs=[full(a) for a in args],
        out_specs=pl.BlockSpec((R, D), lambda i: (0, 0)),
        compiler_params=pltpu.CompilerParams(dimension_semantics=("arbitrary",)),
    )(*args)

    return out_rows.reshape(S, B, D)                      # free reshape back to (S, B, D)


transam_forward = jax.jit(_transam_forward)


# ------------------------- pure-JAX reference & setup -------------------------

def init_params(key, n_states: int, d_model: int, d_ff: int) -> dict:
    keys = iter(jax.random.split(key, 20))

    def w(fan_in, fan_out):
        return jax.random.normal(next(keys), (fan_in, fan_out), jnp.float32) / math.sqrt(fan_in)

    def b(n):
        return 0.05 * jax.random.normal(next(keys), (1, n), jnp.float32)

    p = {}
    p["w1"], p["b1"] = w(n_states, 16), b(16)
    p["w2"], p["b2"] = w(16, d_model), b(d_model)
    p["w3"], p["b3"] = w(d_model, d_model), b(d_model)
    p["wq"], p["bq"] = w(d_model, d_model), b(d_model)
    p["wk"], p["bk"] = w(d_model, d_model), b(d_model)
    p["wv"], p["bv"] = w(d_model, d_model), b(d_model)
    p["wo"], p["bo"] = w(d_model, d_model), b(d_model)
    p["g1"], p["be1"] = jnp.ones((1, d_model), jnp.float32), jnp.zeros((1, d_model), jnp.float32)
    p["wf1"], p["bf1"] = w(d_model, d_ff), b(d_ff)
    p["wf2"], p["bf2"] = w(d_ff, d_model), b(d_model)
    p["g2"], p["be2"] = jnp.ones((1, d_model), jnp.float32), jnp.zeros((1, d_model), jnp.float32)
    return p


def transam_reference(src, p, pe_table, mask):
    hp = lax.Precision.HIGHEST
    S, B, _ = src.shape
    x = src.astype(jnp.float32)

    def lin(h, w, bias):
        return jnp.dot(h, w, precision=hp) + bias

    h = jax.nn.relu(lin(x, p["w1"], p["b1"]))
    h = jax.nn.relu(lin(h, p["w2"], p["b2"]))
    h = jax.nn.relu(lin(h, p["w3"], p["b3"]))
    src_pe = h + pe_table[:S][:, None, :]                             # (S, B, D)
    xb = jnp.transpose(src_pe, (1, 0, 2))                             # (B, S, D)

    q = jnp.einsum("bsd,de->bse", xb, p["wq"], precision=hp) + p["bq"]
    k = jnp.einsum("bsd,de->bse", xb, p["wk"], precision=hp) + p["bk"]
    v = jnp.einsum("bsd,de->bse", xb, p["wv"], precision=hp) + p["bv"]
    D = q.shape[-1]
    scores = jnp.einsum("bsd,btd->bst", q, k, precision=hp) / math.sqrt(D) + mask
    a = jax.nn.softmax(scores, axis=-1)
    ctx = jnp.einsum("bst,btd->bsd", a, v, precision=hp)
    ao = jnp.einsum("bsd,de->bse", ctx, p["wo"], precision=hp) + p["bo"]

    def ln(t, g, beta):
        mu = jnp.mean(t, -1, keepdims=True)
        var = jnp.mean((t - mu) ** 2, -1, keepdims=True)
        return (t - mu) * lax.rsqrt(var + LN_EPS) * g + beta

    y = ln(xb + ao, p["g1"], p["be1"])
    f = jax.nn.relu(jnp.einsum("bsd,df->bsf", y, p["wf1"], precision=hp) + p["bf1"])
    f = jnp.einsum("bsf,fd->bsd", f, p["wf2"], precision=hp) + p["bf2"]
    z = ln(y + f, p["g2"], p["be2"])
    return jnp.transpose(z, (1, 0, 2))                                # (S, B, D)


if __name__ == "__main__":
    # S must be 10: TransAm.forward hard-codes a size-10 causal mask.
    S, B, N_STATES, D_MODEL, D_FF, MAX_LEN = 10, 2, 4, 32, 2048, 64

    key = jax.random.PRNGKey(0)
    k_x, k_p = jax.random.split(key)
    src = jax.random.normal(k_x, (S, B, N_STATES), dtype=jnp.float32)
    params = init_params(k_p, N_STATES, D_MODEL, D_FF)
    pe_table = build_positional_encoding(D_MODEL, MAX_LEN, dtype=jnp.float32)

    prepared = prepare_inputs(params, pe_table, S, B)      # one-time: fused QKV, bf16, masks

    out = transam_forward(src, prepared)
    out = jax.block_until_ready(out)

    ref = transam_reference(src, params, pe_table, build_causal_mask(S))
    assert out.shape == (S, B, D_MODEL)
    err = float(jnp.max(jnp.abs(out - ref)))
    # bf16 matmul inputs with f32 accumulation vs. a Precision.HIGHEST f32 reference.
    assert err < 5e-2, f"mismatch vs reference (max abs err {err})"

    print("KERNEL_OK")
</pallas_src>

<mosaic_0001>
module attributes {stable_mosaic.version = 11 : i64} {
  func.func @_transam_kernel(%arg0: i32, %arg1: memref<20x4xf32, #tpu.memory_space<vmem>>, %arg2: memref<20x32xf32, #tpu.memory_space<vmem>>, %arg3: memref<20x20xf32, #tpu.memory_space<vmem>>, %arg4: memref<4x16xbf16, #tpu.memory_space<vmem>>, %arg5: memref<1x16xf32, #tpu.memory_space<vmem>>, %arg6: memref<16x32xbf16, #tpu.memory_space<vmem>>, %arg7: memref<1x32xf32, #tpu.memory_space<vmem>>, %arg8: memref<32x32xbf16, #tpu.memory_space<vmem>>, %arg9: memref<1x32xf32, #tpu.memory_space<vmem>>, %arg10: memref<32x96xbf16, #tpu.memory_space<vmem>>, %arg11: memref<1x96xf32, #tpu.memory_space<vmem>>, %arg12: memref<32x32xbf16, #tpu.memory_space<vmem>>, %arg13: memref<1x32xf32, #tpu.memory_space<vmem>>, %arg14: memref<1x32xf32, #tpu.memory_space<vmem>>, %arg15: memref<1x32xf32, #tpu.memory_space<vmem>>, %arg16: memref<32x2048xbf16, #tpu.memory_space<vmem>>, %arg17: memref<1x2048xf32, #tpu.memory_space<vmem>>, %arg18: memref<2048x32xbf16, #tpu.memory_space<vmem>>, %arg19: memref<1x32xf32, #tpu.memory_space<vmem>>, %arg20: memref<1x32xf32, #tpu.memory_space<vmem>>, %arg21: memref<1x32xf32, #tpu.memory_space<vmem>>, %arg22: memref<20x32xf32, #tpu.memory_space<vmem>>) attributes {dimension_semantics = [#tpu.dimension_semantics<arbitrary>], iteration_bounds = array<i64: 1>, scalar_prefetch = 0 : i64, scratch_operands = 0 : i64, tpu.core_type = #tpu.core_type<tc>, window_params = [{pipeline_mode = #tpu.pipeline_mode<synchronous>, transform_indices = @transform_0, window_bounds = array<i64: 20, 4>}, {pipeline_mode = #tpu.pipeline_mode<synchronous>, transform_indices = @transform_1, window_bounds = array<i64: 20, 32>}, {pipeline_mode = #tpu.pipeline_mode<synchronous>, transform_indices = @transform_2, window_bounds = array<i64: 20, 20>}, {pipeline_mode = #tpu.pipeline_mode<synchronous>, transform_indices = @transform_3, window_bounds = array<i64: 4, 16>}, {pipeline_mode = #tpu.pipeline_mode<synchronous>, transform_indices = @transform_4, window_bounds = array<i64: 1, 16>}, {pipeline_mode = #tpu.pipeline_mode<synchronous>, transform_indices = @transform_5, window_bounds = array<i64: 16, 32>}, {pipeline_mode = #tpu.pipeline_mode<synchronous>, transform_indices = @transform_6, window_bounds = array<i64: 1, 32>}, {pipeline_mode = #tpu.pipeline_mode<synchronous>, transform_indices = @transform_7, window_bounds = array<i64: 32, 32>}, {pipeline_mode = #tpu.pipeline_mode<synchronous>, transform_indices = @transform_8, window_bounds = array<i64: 1, 32>}, {pipeline_mode = #tpu.pipeline_mode<synchronous>, transform_indices = @transform_9, window_bounds = array<i64: 32, 96>}, {pipeline_mode = #tpu.pipeline_mode<synchronous>, transform_indices = @transform_10, window_bounds = array<i64: 1, 96>}, {pipeline_mode = #tpu.pipeline_mode<synchronous>, transform_indices = @transform_11, window_bounds = array<i64: 32, 32>}, {pipeline_mode = #tpu.pipeline_mode<synchronous>, transform_indices = @transform_12, window_bounds = array<i64: 1, 32>}, {pipeline_mode = #tpu.pipeline_mode<synchronous>, transform_indices = @transform_13, window_bounds = array<i64: 1, 32>}, {pipeline_mode = #tpu.pipeline_mode<synchronous>, transform_indices = @transform_14, window_bounds = array<i64: 1, 32>}, {pipeline_mode = #tpu.pipeline_mode<synchronous>, transform_indices = @transform_15, window_bounds = array<i64: 32, 2048>}, {pipeline_mode = #tpu.pipeline_mode<synchronous>, transform_indices = @transform_16, window_bounds = array<i64: 1, 2048>}, {pipeline_mode = #tpu.pipeline_mode<synchronous>, transform_indices = @transform_17, window_bounds = array<i64: 2048, 32>}, {pipeline_mode = #tpu.pipeline_mode<synchronous>, transform_indices = @transform_18, window_bounds = array<i64: 1, 32>}, {pipeline_mode = #tpu.pipeline_mode<synchronous>, transform_indices = @transform_19, window_bounds = array<i64: 1, 32>}, {pipeline_mode = #tpu.pipeline_mode<synchronous>, transform_indices = @transform_20, window_bounds = array<i64: 1, 32>}, {pipeline_mode = #tpu.pipeline_mode<synchronous>, transform_indices = @transform_21, window_bounds = array<i64: 20, 32>}]} {
    %c0 = arith.constant 0 : index
    %c0_0 = arith.constant 0 : index
    %0 = vector.load %arg1[%c0, %c0_0] : memref<20x4xf32, #tpu.memory_space<vmem>>, vector<20x4xf32>
    %c0_1 = arith.constant 0 : index
    %c0_2 = arith.constant 0 : index
    %1 = vector.load %arg4[%c0_1, %c0_2] : memref<4x16xbf16, #tpu.memory_space<vmem>>, vector<4x16xbf16>
    %2 = arith.truncf %0 : vector<20x4xf32> to vector<20x4xbf16>
    %cst = arith.constant dense<0.000000e+00> : vector<20x16xf32>
    %3 = tpu.matmul %2, %1, %cst {dimension_numbers = #tpu.dot_dimension_numbers<[1], [0], [0], [1], [0, 0, 1, 1], [], []>} : vector<20x4xbf16>, vector<4x16xbf16>, vector<20x16xf32> -> vector<20x16xf32>
    %c0_3 = arith.constant 0 : index
    %c0_4 = arith.constant 0 : index
    %4 = vector.load %arg5[%c0_3, %c0_4] : memref<1x16xf32, #tpu.memory_space<vmem>>, vector<1x16xf32>
    %5 = vector.broadcast %4 : vector<1x16xf32> to vector<20x16xf32>
    %6 = arith.addf %3, %5 : vector<20x16xf32>
    %cst_5 = arith.constant 0.000000e+00 : f32
    %7 = vector.broadcast %cst_5 : f32 to vector<20x16xf32>
    %8 = arith.maximumf %6, %7 : vector<20x16xf32>
    %c0_6 = arith.constant 0 : index
    %c0_7 = arith.constant 0 : index
    %9 = vector.load %arg6[%c0_6, %c0_7] : memref<16x32xbf16, #tpu.memory_space<vmem>>, vector<16x32xbf16>
    %10 = arith.truncf %8 : vector<20x16xf32> to vector<20x16xbf16>
    %cst_8 = arith.constant dense<0.000000e+00> : vector<20x32xf32>
    %11 = tpu.matmul %10, %9, %cst_8 {dimension_numbers = #tpu.dot_dimension_numbers<[1], [0], [0], [1], [0, 0, 1, 1], [], []>} : vector<20x16xbf16>, vector<16x32xbf16>, vector<20x32xf32> -> vector<20x32xf32>
    %c0_9 = arith.constant 0 : index
    %c0_10 = arith.constant 0 : index
    %12 = vector.load %arg7[%c0_9, %c0_10] : memref<1x32xf32, #tpu.memory_space<vmem>>, vector<1x32xf32>
    %13 = vector.broadcast %12 : vector<1x32xf32> to vector<20x32xf32>
    %14 = arith.addf %11, %13 : vector<20x32xf32>
    %cst_11 = arith.constant 0.000000e+00 : f32
    %15 = vector.broadcast %cst_11 : f32 to vector<20x32xf32>
    %16 = arith.maximumf %14, %15 : vector<20x32xf32>
    %c0_12 = arith.constant 0 : index
    %c0_13 = arith.constant 0 : index
    %17 = vector.load %arg8[%c0_12, %c0_13] : memref<32x32xbf16, #tpu.memory_space<vmem>>, vector<32x32xbf16>
    %18 = arith.truncf %16 : vector<20x32xf32> to vector<20x32xbf16>
    %cst_14 = arith.constant dense<0.000000e+00> : vector<20x32xf32>
    %19 = tpu.matmul %18, %17, %cst_14 {dimension_numbers = #tpu.dot_dimension_numbers<[1], [0], [0], [1], [0, 0, 1, 1], [], []>} : vector<20x32xbf16>, vector<32x32xbf16>, vector<20x32xf32> -> vector<20x32xf32>
    %c0_15 = arith.constant 0 : index
    %c0_16 = arith.constant 0 : index
    %20 = vector.load %arg9[%c0_15, %c0_16] : memref<1x32xf32, #tpu.memory_space<vmem>>, vector<1x32xf32>
    %21 = vector.broadcast %20 : vector<1x32xf32> to vector<20x32xf32>
    %22 = arith.addf %19, %21 : vector<20x32xf32>
    %cst_17 = arith.constant 0.000000e+00 : f32
    %23 = vector.broadcast %cst_17 : f32 to vector<20x32xf32>
    %24 = arith.maximumf %22, %23 : vector<20x32xf32>
    %c0_18 = arith.constant 0 : index
    %c0_19 = arith.constant 0 : index
    %25 = vector.load %arg2[%c0_18, %c0_19] : memref<20x32xf32, #tpu.memory_space<vmem>>, vector<20x32xf32>
    %26 = arith.addf %24, %25 : vector<20x32xf32>
    %c0_20 = arith.constant 0 : index
    %c0_21 = arith.constant 0 : index
    %27 = vector.load %arg10[%c0_20, %c0_21] : memref<32x96xbf16, #tpu.memory_space<vmem>>, vector<32x96xbf16>
    %28 = arith.truncf %26 : vector<20x32xf32> to vector<20x32xbf16>
    %cst_22 = arith.constant dense<0.000000e+00> : vector<20x96xf32>
    %29 = tpu.matmul %28, %27, %cst_22 {dimension_numbers = #tpu.dot_dimension_numbers<[1], [0], [0], [1], [0, 0, 1, 1], [], []>} : vector<20x32xbf16>, vector<32x96xbf16>, vector<20x96xf32> -> vector<20x96xf32>
    %c0_23 = arith.constant 0 : index
    %c0_24 = arith.constant 0 : index
    %30 = vector.load %arg11[%c0_23, %c0_24] : memref<1x96xf32, #tpu.memory_space<vmem>>, vector<1x96xf32>
    %31 = vector.broadcast %30 : vector<1x96xf32> to vector<20x96xf32>
    %32 = arith.addf %29, %31 : vector<20x96xf32>
    %33 = vector.extract_strided_slice %32 {offsets = [0, 0], sizes = [20, 32], strides = [1, 1]} : vector<20x96xf32> to vector<20x32xf32>
    %34 = vector.extract_strided_slice %32 {offsets = [0, 32], sizes = [20, 32], strides = [1, 1]} : vector<20x96xf32> to vector<20x32xf32>
    %35 = vector.extract_strided_slice %32 {offsets = [0, 64], sizes = [20, 32], strides = [1, 1]} : vector<20x96xf32> to vector<20x32xf32>
    "tpu.trace_start"() <{level = 10 : i32, message = "rd,cd->rc"}> : () -> ()
    %cst_25 = arith.constant dense<0.000000e+00> : vector<20x20xf32>
    %36 = tpu.matmul %33, %34, %cst_25 {dimension_numbers = #tpu.dot_dimension_numbers<[1], [1], [0], [0], [0, 0, 1, 0], [], []>} : vector<20x32xf32>, vector<20x32xf32>, vector<20x20xf32> -> vector<20x20xf32>
    "tpu.trace_stop"() : () -> ()
    %c0_26 = arith.constant 0 : index
    %c0_27 = arith.constant 0 : index
    %37 = vector.load %arg3[%c0_26, %c0_27] : memref<20x20xf32, #tpu.memory_space<vmem>>, vector<20x20xf32>
    %38 = arith.addf %36, %37 : vector<20x20xf32>
    %cst_28 = arith.constant dense<0xFF800000> : vector<20xf32>
    %39 = vector.multi_reduction <maximumf>, %38, %cst_28 [1] : vector<20x20xf32> to vector<20xf32>
    %40 = vector.shape_cast %39 : vector<20xf32> to vector<20x1xf32>
    %41 = vector.broadcast %40 : vector<20x1xf32> to vector<20x20xf32>
    %42 = arith.subf %38, %41 : vector<20x20xf32>
    %43 = math.exp %42 : vector<20x20xf32>
    %cst_29 = arith.constant dense<0.000000e+00> : vector<20xf32>
    %44 = vector.multi_reduction <add>, %43, %cst_29 [1] : vector<20x20xf32> to vector<20xf32>
    %45 = vector.shape_cast %44 : vector<20xf32> to vector<20x1xf32>
    %46 = tpu.reciprocal %45 {approx = true} : vector<20x1xf32> -> vector<20x1xf32>
    %47 = vector.broadcast %46 : vector<20x1xf32> to vector<20x20xf32>
    %48 = arith.mulf %43, %47 : vector<20x20xf32>
    %cst_30 = arith.constant dense<0.000000e+00> : vector<20x32xf32>
    %49 = tpu.matmul %48, %35, %cst_30 {dimension_numbers = #tpu.dot_dimension_numbers<[1], [0], [0], [1], [0, 0, 1, 1], [], []>} : vector<20x20xf32>, vector<20x32xf32>, vector<20x32xf32> -> vector<20x32xf32>
    %c0_31 = arith.constant 0 : index
    %c0_32 = arith.constant 0 : index
    %50 = vector.load %arg12[%c0_31, %c0_32] : memref<32x32xbf16, #tpu.memory_space<vmem>>, vector<32x32xbf16>
    %51 = arith.truncf %49 : vector<20x32xf32> to vector<20x32xbf16>
    %cst_33 = arith.constant dense<0.000000e+00> : vector<20x32xf32>
    %52 = tpu.matmul %51, %50, %cst_33 {dimension_numbers = #tpu.dot_dimension_numbers<[1], [0], [0], [1], [0, 0, 1, 1], [], []>} : vector<20x32xbf16>, vector<32x32xbf16>, vector<20x32xf32> -> vector<20x32xf32>
    %c0_34 = arith.constant 0 : index
    %c0_35 = arith.constant 0 : index
    %53 = vector.load %arg13[%c0_34, %c0_35] : memref<1x32xf32, #tpu.memory_space<vmem>>, vector<1x32xf32>
    %54 = vector.broadcast %53 : vector<1x32xf32> to vector<20x32xf32>
    %55 = arith.addf %52, %54 : vector<20x32xf32>
    %56 = arith.addf %26, %55 : vector<20x32xf32>
    %cst_36 = arith.constant dense<0.000000e+00> : vector<20xf32>
    %57 = vector.multi_reduction <add>, %56, %cst_36 [1] : vector<20x32xf32> to vector<20xf32>
    %58 = vector.shape_cast %57 : vector<20xf32> to vector<20x1xf32>
    %cst_37 = arith.constant 3.200000e+01 : f32
    %59 = vector.broadcast %cst_37 : f32 to vector<20x1xf32>
    %60 = arith.divf %58, %59 : vector<20x1xf32>
    %61 = vector.broadcast %60 : vector<20x1xf32> to vector<20x32xf32>
    %62 = arith.subf %56, %61 : vector<20x32xf32>
    %63 = arith.mulf %62, %62 : vector<20x32xf32>
    %cst_38 = arith.constant dense<0.000000e+00> : vector<20xf32>
    %64 = vector.multi_reduction <add>, %63, %cst_38 [1] : vector<20x32xf32> to vector<20xf32>
    %65 = vector.shape_cast %64 : vector<20xf32> to vector<20x1xf32>
    %cst_39 = arith.constant 3.200000e+01 : f32
    %66 = vector.broadcast %cst_39 : f32 to vector<20x1xf32>
    %67 = arith.divf %65, %66 : vector<20x1xf32>
    %68 = vector.broadcast %60 : vector<20x1xf32> to vector<20x32xf32>
    %69 = arith.subf %56, %68 : vector<20x32xf32>
    %cst_40 = arith.constant 9.99999974E-6 : f32
    %70 = vector.broadcast %cst_40 : f32 to vector<20x1xf32>
    %71 = arith.addf %67, %70 : vector<20x1xf32>
    %72 = math.rsqrt %71 : vector<20x1xf32>
    %73 = vector.broadcast %72 : vector<20x1xf32> to vector<20x32xf32>
    %74 = arith.mulf %69, %73 : vector<20x32xf32>
    %c0_41 = arith.constant 0 : index
    %c0_42 = arith.constant 0 : index
    %75 = vector.load %arg14[%c0_41, %c0_42] : memref<1x32xf32, #tpu.memory_space<vmem>>, vector<1x32xf32>
    %76 = vector.broadcast %75 : vector<1x32xf32> to vector<20x32xf32>
    %77 = arith.mulf %74, %76 : vector<20x32xf32>
    %c0_43 = arith.constant 0 : index
    %c0_44 = arith.constant 0 : index
    %78 = vector.load %arg15[%c0_43, %c0_44] : memref<1x32xf32, #tpu.memory_space<vmem>>, vector<1x32xf32>
    %79 = vector.broadcast %78 : vector<1x32xf32> to vector<20x32xf32>
    %80 = arith.addf %77, %79 : vector<20x32xf32>
    %81 = arith.truncf %80 : vector<20x32xf32> to vector<20x32xbf16>
    %cst_45 = arith.constant 0.000000e+00 : f32
    %82 = vector.broadcast %cst_45 : f32 to vector<20x32xf32>
    %c0_46 = arith.constant 0 : index
    %c0_47 = arith.constant 0 : index
    %83 = vector.load %arg16[%c0_46, %c0_47] : memref<32x2048xbf16, #tpu.memory_space<vmem>>, vector<32x512xbf16>
    %cst_48 = arith.constant dense<0.000000e+00> : vector<20x512xf32>
    %84 = tpu.matmul %81, %83, %cst_48 {dimension_numbers = #tpu.dot_dimension_numbers<[1], [0], [0], [1], [0, 0, 1, 1], [], []>} : vector<20x32xbf16>, vector<32x512xbf16>, vector<20x512xf32> -> vector<20x512xf32>
    %c0_49 = arith.constant 0 : index
    %c0_50 = arith.constant 0 : index
    %85 = vector.load %arg17[%c0_49, %c0_50] : memref<1x2048xf32, #tpu.memory_space<vmem>>, vector<1x512xf32>
    %86 = vector.broadcast %85 : vector<1x512xf32> to vector<20x512xf32>
    %87 = arith.addf %84, %86 : vector<20x512xf32>
    %cst_51 = arith.constant 0.000000e+00 : f32
    %88 = vector.broadcast %cst_51 : f32 to vector<20x512xf32>
    %89 = arith.maximumf %87, %88 : vector<20x512xf32>
    %90 = arith.truncf %89 : vector<20x512xf32> to vector<20x512xbf16>
    %c0_52 = arith.constant 0 : index
    %c0_53 = arith.constant 0 : index
    %91 = vector.load %arg18[%c0_52, %c0_53] : memref<2048x32xbf16, #tpu.memory_space<vmem>>, vector<512x32xbf16>
    %cst_54 = arith.constant dense<0.000000e+00> : vector<20x32xf32>
    %92 = tpu.matmul %90, %91, %cst_54 {dimension_numbers = #tpu.dot_dimension_numbers<[1], [0], [0], [1], [0, 0, 1, 1], [], []>} : vector<20x512xbf16>, vector<512x32xbf16>, vector<20x32xf32> -> vector<20x32xf32>
    %93 = arith.addf %82, %92 : vector<20x32xf32>
    %c0_55 = arith.constant 0 : index
    %c512 = arith.constant 512 : index
    %94 = vector.load %arg16[%c0_55, %c512] : memref<32x2048xbf16, #tpu.memory_space<vmem>>, vector<32x512xbf16>
    %cst_56 = arith.constant dense<0.000000e+00> : vector<20x512xf32>
    %95 = tpu.matmul %81, %94, %cst_56 {dimension_numbers = #tpu.dot_dimension_numbers<[1], [0], [0], [1], [0, 0, 1, 1], [], []>} : vector<20x32xbf16>, vector<32x512xbf16>, vector<20x512xf32> -> vector<20x512xf32>
    %c0_57 = arith.constant 0 : index
    %c512_58 = arith.constant 512 : index
    %96 = vector.load %arg17[%c0_57, %c512_58] : memref<1x2048xf32, #tpu.memory_space<vmem>>, vector<1x512xf32>
    %97 = vector.broadcast %96 : vector<1x512xf32> to vector<20x512xf32>
    %98 = arith.addf %95, %97 : vector<20x512xf32>
    %cst_59 = arith.constant 0.000000e+00 : f32
    %99 = vector.broadcast %cst_59 : f32 to vector<20x512xf32>
    %100 = arith.maximumf %98, %99 : vector<20x512xf32>
    %101 = arith.truncf %100 : vector<20x512xf32> to vector<20x512xbf16>
    %c512_60 = arith.constant 512 : index
    %c0_61 = arith.constant 0 : index
    %102 = vector.load %arg18[%c512_60, %c0_61] : memref<2048x32xbf16, #tpu.memory_space<vmem>>, vector<512x32xbf16>
    %cst_62 = arith.constant dense<0.000000e+00> : vector<20x32xf32>
    %103 = tpu.matmul %101, %102, %cst_62 {dimension_numbers = #tpu.dot_dimension_numbers<[1], [0], [0], [1], [0, 0, 1, 1], [], []>} : vector<20x512xbf16>, vector<512x32xbf16>, vector<20x32xf32> -> vector<20x32xf32>
    %104 = arith.addf %93, %103 : vector<20x32xf32>
    %c0_63 = arith.constant 0 : index
    %c1024 = arith.constant 1024 : index
    %105 = vector.load %arg16[%c0_63, %c1024] : memref<32x2048xbf16, #tpu.memory_space<vmem>>, vector<32x512xbf16>
    %cst_64 = arith.constant dense<0.000000e+00> : vector<20x512xf32>
    %106 = tpu.matmul %81, %105, %cst_64 {dimension_numbers = #tpu.dot_dimension_numbers<[1], [0], [0], [1], [0, 0, 1, 1], [], []>} : vector<20x32xbf16>, vector<32x512xbf16>, vector<20x512xf32> -> vector<20x512xf32>
    %c0_65 = arith.constant 0 : index
    %c1024_66 = arith.constant 1024 : index
    %107 = vector.load %arg17[%c0_65, %c1024_66] : memref<1x2048xf32, #tpu.memory_space<vmem>>, vector<1x512xf32>
    %108 = vector.broadcast %107 : vector<1x512xf32> to vector<20x512xf32>
    %109 = arith.addf %106, %108 : vector<20x512xf32>
    %cst_67 = arith.constant 0.000000e+00 : f32
    %110 = vector.broadcast %cst_67 : f32 to vector<20x512xf32>
    %111 = arith.maximumf %109, %110 : vector<20x512xf32>
    %112 = arith.truncf %111 : vector<20x512xf32> to vector<20x512xbf16>
    %c1024_68 = arith.constant 1024 : index
    %c0_69 = arith.constant 0 : index
    %113 = vector.load %arg18[%c1024_68, %c0_69] : memref<2048x32xbf16, #tpu.memory_space<vmem>>, vector<512x32xbf16>
    %cst_70 = arith.constant dense<0.000000e+00> : vector<20x32xf32>
    %114 = tpu.matmul %112, %113, %cst_70 {dimension_numbers = #tpu.dot_dimension_numbers<[1], [0], [0], [1], [0, 0, 1, 1], [], []>} : vector<20x512xbf16>, vector<512x32xbf16>, vector<20x32xf32> -> vector<20x32xf32>
    %115 = arith.addf %104, %114 : vector<20x32xf32>
    %c0_71 = arith.constant 0 : index
    %c1536 = arith.constant 1536 : index
    %116 = vector.load %arg16[%c0_71, %c1536] : memref<32x2048xbf16, #tpu.memory_space<vmem>>, vector<32x512xbf16>
    %cst_72 = arith.constant dense<0.000000e+00> : vector<20x512xf32>
    %117 = tpu.matmul %81, %116, %cst_72 {dimension_numbers = #tpu.dot_dimension_numbers<[1], [0], [0], [1], [0, 0, 1, 1], [], []>} : vector<20x32xbf16>, vector<32x512xbf16>, vector<20x512xf32> -> vector<20x512xf32>
    %c0_73 = arith.constant 0 : index
    %c1536_74 = arith.constant 1536 : index
    %118 = vector.load %arg17[%c0_73, %c1536_74] : memref<1x2048xf32, #tpu.memory_space<vmem>>, vector<1x512xf32>
    %119 = vector.broadcast %118 : vector<1x512xf32> to vector<20x512xf32>
    %120 = arith.addf %117, %119 : vector<20x512xf32>
    %cst_75 = arith.constant 0.000000e+00 : f32
    %121 = vector.broadcast %cst_75 : f32 to vector<20x512xf32>
    %122 = arith.maximumf %120, %121 : vector<20x512xf32>
    %123 = arith.truncf %122 : vector<20x512xf32> to vector<20x512xbf16>
    %c1536_76 = arith.constant 1536 : index
    %c0_77 = arith.constant 0 : index
    %124 = vector.load %arg18[%c1536_76, %c0_77] : memref<2048x32xbf16, #tpu.memory_space<vmem>>, vector<512x32xbf16>
    %cst_78 = arith.constant dense<0.000000e+00> : vector<20x32xf32>
    %125 = tpu.matmul %123, %124, %cst_78 {dimension_numbers = #tpu.dot_dimension_numbers<[1], [0], [0], [1], [0, 0, 1, 1], [], []>} : vector<20x512xbf16>, vector<512x32xbf16>, vector<20x32xf32> -> vector<20x32xf32>
    %126 = arith.addf %115, %125 : vector<20x32xf32>
    %127 = arith.addf %80, %126 : vector<20x32xf32>
    %c0_79 = arith.constant 0 : index
    %c0_80 = arith.constant 0 : index
    %128 = vector.load %arg19[%c0_79, %c0_80] : memref<1x32xf32, #tpu.memory_space<vmem>>, vector<1x32xf32>
    %129 = vector.broadcast %128 : vector<1x32xf32> to vector<20x32xf32>
    %130 = arith.addf %127, %129 : vector<20x32xf32>
    %cst_81 = arith.constant dense<0.000000e+00> : vector<20xf32>
    %131 = vector.multi_reduction <add>, %130, %cst_81 [1] : vector<20x32xf32> to vector<20xf32>
    %132 = vector.shape_cast %131 : vector<20xf32> to vector<20x1xf32>
    %cst_82 = arith.constant 3.200000e+01 : f32
    %133 = vector.broadcast %cst_82 : f32 to vector<20x1xf32>
    %134 = arith.divf %132, %133 : vector<20x1xf32>
    %135 = vector.broadcast %134 : vector<20x1xf32> to vector<20x32xf32>
    %136 = arith.subf %130, %135 : vector<20x32xf32>
    %137 = arith.mulf %136, %136 : vector<20x32xf32>
    %cst_83 = arith.constant dense<0.000000e+00> : vector<20xf32>
    %138 = vector.multi_reduction <add>, %137, %cst_83 [1] : vector<20x32xf32> to vector<20xf32>
    %139 = vector.shape_cast %138 : vector<20xf32> to vector<20x1xf32>
    %cst_84 = arith.constant 3.200000e+01 : f32
    %140 = vector.broadcast %cst_84 : f32 to vector<20x1xf32>
    %141 = arith.divf %139, %140 : vector<20x1xf32>
    %142 = vector.broadcast %134 : vector<20x1xf32> to vector<20x32xf32>
    %143 = arith.subf %130, %142 : vector<20x32xf32>
    %cst_85 = arith.constant 9.99999974E-6 : f32
    %144 = vector.broadcast %cst_85 : f32 to vector<20x1xf32>
    %145 = arith.addf %141, %144 : vector<20x1xf32>
    %146 = math.rsqrt %145 : vector<20x1xf32>
    %147 = vector.broadcast %146 : vector<20x1xf32> to vector<20x32xf32>
    %148 = arith.mulf %143, %147 : vector<20x32xf32>
    %c0_86 = arith.constant 0 : index
    %c0_87 = arith.constant 0 : index
    %149 = vector.load %arg20[%c0_86, %c0_87] : memref<1x32xf32, #tpu.memory_space<vmem>>, vector<1x32xf32>
    %150 = vector.broadcast %149 : vector<1x32xf32> to vector<20x32xf32>
    %151 = arith.mulf %148, %150 : vector<20x32xf32>
    %c0_88 = arith.constant 0 : index
    %c0_89 = arith.constant 0 : index
    %152 = vector.load %arg21[%c0_88, %c0_89] : memref<1x32xf32, #tpu.memory_space<vmem>>, vector<1x32xf32>
    %153 = vector.broadcast %152 : vector<1x32xf32> to vector<20x32xf32>
    %154 = arith.addf %151, %153 : vector<20x32xf32>
    %c0_90 = arith.constant 0 : index
    %c0_91 = arith.constant 0 : index
    %155 = vector.load %arg22[%c0_90, %c0_91] : memref<20x32xf32, #tpu.memory_space<vmem>>, vector<20x32xf32>
    tpu.vector_store %arg22[%c0_90, %c0_91], %154 {strides = array<i32>} : memref<20x32xf32, #tpu.memory_space<vmem>>, vector<20x32xf32>,
    return
  }
  func.func @transform_0(%arg0: i32) -> (i32, i32) {
    %c0_i32 = arith.constant 0 : i32
    %c0_i32_0 = arith.constant 0 : i32
    %c0_i32_1 = arith.constant 0 : i32
    return %c0_i32, %c0_i32_0 : i32, i32
  }
  func.func @transform_1(%arg0: i32) -> (i32, i32) {
    %c0_i32 = arith.constant 0 : i32
    %c0_i32_0 = arith.constant 0 : i32
    %c0_i32_1 = arith.constant 0 : i32
    return %c0_i32, %c0_i32_0 : i32, i32
  }
  func.func @transform_2(%arg0: i32) -> (i32, i32) {
    %c0_i32 = arith.constant 0 : i32
    %c0_i32_0 = arith.constant 0 : i32
    %c0_i32_1 = arith.constant 0 : i32
    return %c0_i32, %c0_i32_0 : i32, i32
  }
  func.func @transform_3(%arg0: i32) -> (i32, i32) {
    %c0_i32 = arith.constant 0 : i32
    %c0_i32_0 = arith.constant 0 : i32
    %c0_i32_1 = arith.constant 0 : i32
    return %c0_i32, %c0_i32_0 : i32, i32
  }
  func.func @transform_4(%arg0: i32) -> (i32, i32) {
    %c0_i32 = arith.constant 0 : i32
    %c0_i32_0 = arith.constant 0 : i32
    %c0_i32_1 = arith.constant 0 : i32
    return %c0_i32, %c0_i32_0 : i32, i32
  }
  func.func @transform_5(%arg0: i32) -> (i32, i32) {
    %c0_i32 = arith.constant 0 : i32
    %c0_i32_0 = arith.constant 0 : i32
    %c0_i32_1 = arith.constant 0 : i32
    return %c0_i32, %c0_i32_0 : i32, i32
  }
  func.func @transform_6(%arg0: i32) -> (i32, i32) {
    %c0_i32 = arith.constant 0 : i32
    %c0_i32_0 = arith.constant 0 : i32
    %c0_i32_1 = arith.constant 0 : i32
    return %c0_i32, %c0_i32_0 : i32, i32
  }
  func.func @transform_7(%arg0: i32) -> (i32, i32) {
    %c0_i32 = arith.constant 0 : i32
    %c0_i32_0 = arith.constant 0 : i32
    %c0_i32_1 = arith.constant 0 : i32
    return %c0_i32, %c0_i32_0 : i32, i32
  }
  func.func @transform_8(%arg0: i32) -> (i32, i32) {
    %c0_i32 = arith.constant 0 : i32
    %c0_i32_0 = arith.constant 0 : i32
    %c0_i32_1 = arith.constant 0 : i32
    return %c0_i32, %c0_i32_0 : i32, i32
  }
  func.func @transform_9(%arg0: i32) -> (i32, i32) {
    %c0_i32 = arith.constant 0 : i32
    %c0_i32_0 = arith.constant 0 : i32
    %c0_i32_1 = arith.constant 0 : i32
    return %c0_i32, %c0_i32_0 : i32, i32
  }
  func.func @transform_10(%arg0: i32) -> (i32, i32) {
    %c0_i32 = arith.constant 0 : i32
    %c0_i32_0 = arith.constant 0 : i32
    %c0_i32_1 = arith.constant 0 : i32
    return %c0_i32, %c0_i32_0 : i32, i32
  }
  func.func @transform_11(%arg0: i32) -> (i32, i32) {
    %c0_i32 = arith.constant 0 : i32
    %c0_i32_0 = arith.constant 0 : i32
    %c0_i32_1 = arith.constant 0 : i32
    return %c0_i32, %c0_i32_0 : i32, i32
  }
  func.func @transform_12(%arg0: i32) -> (i32, i32) {
    %c0_i32 = arith.constant 0 : i32
    %c0_i32_0 = arith.constant 0 : i32
    %c0_i32_1 = arith.constant 0 : i32
    return %c0_i32, %c0_i32_0 : i32, i32
  }
  func.func @transform_13(%arg0: i32) -> (i32, i32) {
    %c0_i32 = arith.constant 0 : i32
    %c0_i32_0 = arith.constant 0 : i32
    %c0_i32_1 = arith.constant 0 : i32
    return %c0_i32, %c0_i32_0 : i32, i32
  }
  func.func @transform_14(%arg0: i32) -> (i32, i32) {
    %c0_i32 = arith.constant 0 : i32
    %c0_i32_0 = arith.constant 0 : i32
    %c0_i32_1 = arith.constant 0 : i32
    return %c0_i32, %c0_i32_0 : i32, i32
  }
  func.func @transform_15(%arg0: i32) -> (i32, i32) {
    %c0_i32 = arith.constant 0 : i32
    %c0_i32_0 = arith.constant 0 : i32
    %c0_i32_1 = arith.constant 0 : i32
    return %c0_i32, %c0_i32_0 : i32, i32
  }
  func.func @transform_16(%arg0: i32) -> (i32, i32) {
    %c0_i32 = arith.constant 0 : i32
    %c0_i32_0 = arith.constant 0 : i32
    %c0_i32_1 = arith.constant 0 : i32
    return %c0_i32, %c0_i32_0 : i32, i32
  }
  func.func @transform_17(%arg0: i32) -> (i32, i32) {
    %c0_i32 = arith.constant 0 : i32
    %c0_i32_0 = arith.constant 0 : i32
    %c0_i32_1 = arith.constant 0 : i32
    return %c0_i32, %c0_i32_0 : i32, i32
  }
  func.func @transform_18(%arg0: i32) -> (i32, i32) {
    %c0_i32 = arith.constant 0 : i32
    %c0_i32_0 = arith.constant 0 : i32
    %c0_i32_1 = arith.constant 0 : i32
    return %c0_i32, %c0_i32_0 : i32, i32
  }
  func.func @transform_19(%arg0: i32) -> (i32, i32) {
    %c0_i32 = arith.constant 0 : i32
    %c0_i32_0 = arith.constant 0 : i32
    %c0_i32_1 = arith.constant 0 : i32
    return %c0_i32, %c0_i32_0 : i32, i32
  }
  func.func @transform_20(%arg0: i32) -> (i32, i32) {
    %c0_i32 = arith.constant 0 : i32
    %c0_i32_0 = arith.constant 0 : i32
    %c0_i32_1 = arith.constant 0 : i32
    return %c0_i32, %c0_i32_0 : i32, i32
  }
  func.func @transform_21(%arg0: i32) -> (i32, i32) {
    %c0_i32 = arith.constant 0 : i32
    %c0_i32_0 = arith.constant 0 : i32
    %c0_i32_1 = arith.constant 0 : i32
    return %c0_i32, %c0_i32_0 : i32, i32
  }
}

</mosaic_0001>

<bundles_post_ra>
// kernel: _transam_forward.1
= control target key start
LH: loop header
LB: loop body
LE: loop exit
PB: predicated region body
PF: predicated region fallthrough
CT: control target
= control target key end

     0   :  { %vm86_vm0 = vcmask 1041408   ;;  %vm79_vm1 = vcmask 31744   ;;  %vm125_vm2 = vcmask 130048   ;;  %vm175_vm3 = vcmask 261120   ;;  %s3479_s29 = smov 96   ;;  %s4519_s3 = inlined_call_operand.vmem [shape: bf16[4,16], index: 3, kind: input, shape index: {}]   ;;  %s4520_s0 = inlined_call_operand.vmem [shape: f32[20,4], index: 0, kind: input, shape index: {}]   ;;  %s4521_s4 = inlined_call_operand.vmem [shape: f32[1,16], index: 4, kind: input, shape index: {}]   ;;  %s4522_s6 = inlined_call_operand.vmem [shape: f32[1,32], index: 6, kind: input, shape index: {}]   ;;  %s4523_s5 = inlined_call_operand.vmem [shape: bf16[16,32], index: 5, kind: input, shape index: {}]   ;;  %s4524_s8 = inlined_call_operand.vmem [shape: f32[1,32], index: 8, kind: input, shape index: {}]   ;;  %s4525_s7 = inlined_call_operand.vmem [shape: bf16[32,32], index: 7, kind: input, shape index: {}]   ;;  %s4526_s10 = inlined_call_operand.vmem [shape: f32[1,96], index: 10, kind: input, shape index: {}]   ;;  %s4527_s9 = inlined_call_operand.vmem [shape: bf16[32,96], index: 9, kind: input, shape index: {}]   ;;  %s4528_s1 = inlined_call_operand.vmem [shape: f32[20,32], index: 1, kind: input, shape index: {}]   ;;  %s4529_s2 = inlined_call_operand.vmem [shape: f32[20,20], index: 2, kind: input, shape index: {}]   ;;  %s4530_s12 = inlined_call_operand.vmem [shape: f32[1,32], index: 12, kind: input, shape index: {}]   ;;  %s4531_s11 = inlined_call_operand.vmem [shape: bf16[32,32], index: 11, kind: input, shape index: {}]   ;;  %s4532_s13 = inlined_call_operand.vmem [shape: f32[1,32], index: 13, kind: input, shape index: {}]   ;;  %s4533_s14 = inlined_call_operand.vmem [shape: f32[1,32], index: 14, kind: input, shape index: {}]   ;;  %s4534_s15 = inlined_call_operand.vmem [shape: bf16[32,2048], index: 15, kind: input, shape index: {}]   ;;  %s4535_s17 = inlined_call_operand.vmem [shape: bf16[2048,32], index: 17, kind: input, shape index: {}]   ;;  %s4536_s16 = inlined_call_operand.vmem [shape: f32[1,2048], index: 16, kind: input, shape index: {}]   ;;  %s4537_s18 = inlined_call_operand.vmem [shape: f32[1,32], index: 18, kind: input, shape index: {}]   ;;  %s4538_s19 = inlined_call_operand.vmem [shape: f32[1,32], index: 19, kind: input, shape index: {}]   ;;  %s4539_s20 = inlined_call_operand.vmem [shape: f32[1,32], index: 20, kind: input, shape index: {}]   ;;  %s4540_s21 = inlined_call_operand.vmem [shape: f32[20,32], index: 21, kind: output, shape index: {}]  }
   0x1   :  { %4542 = sst [smem:[#allocation2_spill]] %s4519_s3  ;;  %v3268_v21 = vld [vmem:[%s4525_s7 + $0x8] sm:$0xff]  ;;  %v3267_v22 = vld [vmem:[%s4525_s7] sm:$0xff]  ;;  %v205_v54 = vld [vmem:[%s4528_s1 + $0x10] sm:$0xf]  ;;  %vm305_vm4 = vcmask 162816  }
   0x2   :  { %4543 = sst [smem:[#allocation3_spill]] %s4520_s0  ;;  %188 = vmatpush.bf16.msra.mxu2 %v3268_v21  ;;  %3433 = vmatpush.bf16.msra.mxu3 %v3268_v21  ;;  %v3270_v36 = vld [vmem:[%s4527_s9 + $0x8] sm:$0xff]  ;;  %v3269_v37 = vld [vmem:[%s4527_s9] sm:$0xff]  ;;  %vm312_vm5 = vcmask 158720   ;;  %vm357_vm6 = vcmask 1043456   ;;  %vm441_vm7 = vcmask 257024  }
   0x3   :  { %4544 = sst [smem:[#allocation4_spill]] %s4521_s4  ;;  %v203_v45 = vld [vmem:[%s4528_s1] sm:$0xff]  ;;  %v204_v46 = vld [vmem:[%s4528_s1 + $0x8] sm:$0xff] }
   0x4   :  { %4545 = sst [smem:[#allocation5_spill]] %s4522_s6  ;;  %v3446_v57 = vld [vmem:[%s4526_s10] ss:$0 sm:$0xff] }
   0x5   :  { %4546 = sst [smem:[#allocation6_spill]] %s4523_s5 }
   0x6   :  { %4547 = sst [smem:[#allocation7_spill]] %s4524_s8  ;;  %189 = vmatpush.bf16.msra.mxu2 %v3267_v22  ;;  %3434 = vmatpush.bf16.msra.mxu3 %v3267_v22  ;;  %s3480_s8 = smov 64  }
   0x7   :  { %s4548_s26 = sld [smem:[#allocation2_spill]] }
   0x8   :  { %s4549_s28 = sld [smem:[#allocation3_spill]] }
   0x9   :  { %s4550_s23 = sld [smem:[#allocation6_spill]] }
   0xa   :  { %s4551_s4 = sld [smem:[#allocation4_spill]]  ;;  %243 = vmatpush.bf16.msrb.mxu3 %v3270_v36 }
   0xb   :  { %s4552_s3 = sld [smem:[#allocation5_spill]] }
   0xc   :  { %s4553_s0 = sld [smem:[#allocation7_spill]] }
   0xd   :  { %v72_v0 = vld [vmem:[%s4548_s26] sm:$0x3] }
   0xe   :  { %v69_v1 = vld [vmem:[%s4549_s28] sm:$0xff]  ;;  %v70_v2 = vld [vmem:[%s4549_s28 + $0x8] sm:$0xff]  ;;  %v88_v3 = vsel %vm86_vm0, %v72_v0, 0  ;;  %v71_v5 = vld [vmem:[%s4549_s28 + $0x10] sm:$0xf]  ;;  %244 = vmatpush.bf16.msrb.mxu3 %v3269_v37 }
   0xf   :  { %v73_v4 = vpack.c.bf16 %v70_v2, %v69_v1  ;;  %97 = vmatpush.bf16.msra.mxu0 %v88_v3  ;;  %v74_v6 = vpack.c.bf16 %v71_v5, %v71_v5  ;;  %v3266_v7 = vld [vmem:[%s4550_s23] sm:$0xff] }
  0x10   :  { %139 = vmatpush.bf16.msra.mxu1 %v3266_v7  ;;  %v3443_v9 = vld [vmem:[%s4551_s4] ss:$0 sm:$0xff] }
  0x11   :  { %v3444_v24 = vld [vmem:[%s4552_s3] ss:$0 sm:$0xff] }
  0x12   :  { %2546 = vmatmul.msk.bf16.vlgmr.msra.gmra.mxu0 %vm79_vm1, %v73_v4  ;;  %v3445_v39 = vld [vmem:[%s4553_s0] ss:$0 sm:$0xff] }
  0x13   :  { %v255_v4 = vld [vmem:[%s4529_s2] sm:$0xff] }
  0x22   :  { %2547 = vmatmul.msk.bf16.gmra.mxu0 %vm79_vm1, %v74_v6 }
  0x8f   :  { %v99_v8 = vpop.f32.mrf.mxu0 }
  0x90   :  { %v100_v10 = vadd.f32 %v3443_v9, %v99_v8  ;;  %v256_v8 = vld [vmem:[%s4529_s2 + $0x8] sm:$0xff] }
  0x92   :  { %v108_v13 = vmax.f32 %v100_v10, 0.0 }
  0x97   :  { %v101_v11 = vpop.f32.mrf.mxu0 }
  0x98   :  { %v102_v12 = vadd.f32 %v3443_v9, %v101_v11 }
  0x9a   :  { %v109_v14 = vmax.f32 %v102_v12, 0.0  ;;  %v257_v12 = vld [vmem:[%s4529_s2 + $0x10] sm:$0xf] }
  0x9c   :  { %v113_v15 = vpack.c.bf16 %v109_v14, %v108_v13 }
  0x9e   :  { %2552 = vmatmul.msk.bf16.vlgmr.msra.gmra.mxu1 %vm125_vm2, %v113_v15 }
  0x9f   :  { %v104_v16 = vpop.f32.mrf.mxu0 }
  0xa0   :  { %v105_v17 = vadd.f32 %v3443_v9, %v104_v16 }
  0xa2   :  { %v110_v18 = vmax.f32 %v105_v17, 0.0 }
  0xa4   :  { %v114_v20 = vpack.c.bf16 %v110_v18, %v110_v18 }
  0xa7   :  { %v106_v19 = vpop.f32.mrf.mxu0 }
  0xae   :  { %2553 = vmatmul.msk.bf16.gmra.mxu1 %vm125_vm2, %v114_v20 }
 0x11b   :  { %v141_v23 = vpop.f32.mrf.mxu1 }
 0x11c   :  { %v142_v25 = vadd.f32 %v3444_v24, %v141_v23 }
 0x11e   :  { %v150_v28 = vmax.f32 %v142_v25, 0.0 }
 0x123   :  { %v143_v26 = vpop.f32.mrf.mxu1 }
 0x124   :  { %v144_v27 = vadd.f32 %v3444_v24, %v143_v26 }
 0x126   :  { %v151_v29 = vmax.f32 %v144_v27, 0.0 }
 0x128   :  { %v157_v30 = vpack.c.bf16 %v151_v29, %v150_v28 }
 0x12a   :  { %2562 = vmatmul.msk.bf16.vlgmr.msra.gmra.mxu2 %vm175_vm3, %v157_v30 }
 0x12b   :  { %v146_v31 = vpop.f32.mrf.mxu1 }
 0x12c   :  { %v147_v32 = vadd.f32 %v3444_v24, %v146_v31 }
 0x12e   :  { %v152_v33 = vmax.f32 %v147_v32, 0.0 }
 0x130   :  { %v158_v34 = vpack.c.bf16 %v152_v33, %v152_v33 }
 0x132   :  { %2563 = vmatmul.msk.bf16.vlgmr.msra.gmra.mxu3 %vm175_vm3, %v158_v34 }
 0x133   :  { %v148_v35 = vpop.f32.mrf.mxu1 }
 0x1ad   :  { %v191_v38 = vpop.f32.mrf.mxu2 }
 0x1ae   :  { %v192_v40 = vadd.f32 %v3445_v39, %v191_v38 }
 0x1b0   :  { %v200_v43 = vmax.f32 %v192_v40, 0.0 }
 0x1b2   :  { %v3636_v48 = vadd.f32 %v203_v45, %v200_v43  ;;  %v3272_v45 = vld [vmem:[%s4531_s11 + $0x8] sm:$0xff] }
 0x1b3   :  { %420 = vmatpush.bf16.msrb.mxu2 %v3272_v45 }
 0x1b5   :  { %v193_v41 = vpop.f32.mrf.mxu2  ;;  %v196_v42 = vpop.f32.mrf.mxu3 }
 0x1b6   :  { %v194_v44 = vadd.f32 %v3445_v39, %v193_v41  ;;  %v197_v52 = vadd.f32 %v3445_v39, %v196_v42 }
 0x1b8   :  { %v201_v47 = vmax.f32 %v194_v44, 0.0  ;;  %v202_v53 = vmax.f32 %v197_v52, 0.0 }
 0x1ba   :  { %v3638_v49 = vadd.f32 %v204_v46, %v201_v47  ;;  %v3646_v55 = vadd.f32 %v205_v54, %v202_v53  ;;  %v3271_v46 = vld [vmem:[%s4531_s11] sm:$0xff] }
 0x1bb   :  { %421 = vmatpush.bf16.msrb.mxu2 %v3271_v46  ;;  %v3447_v54 = vld [vmem:[%s4530_s12] ss:$0 sm:$0xff] }
 0x1bc   :  { %v213_v50 = vpack.c.bf16 %v3638_v49, %v3636_v48  ;;  %v214_v56 = vpack.c.bf16 %v3646_v55, %v3646_v55 }
 0x1bd   :  { %v198_v51 = vpop.f32.mrf.mxu3 }
 0x1be   :  { %2572 = vmatmul.msk.bf16.vlgmr.msrb.gmra.mxu3 %vm175_vm3, %v213_v50 }
 0x1ce   :  { %2573 = vmatmul.msk.bf16.gmra.mxu3 %vm175_vm3, %v214_v56 }
 0x241   :  { %v246_v58 = vpop.f32.mrf.mxu3 }
 0x242   :  { %v247_v59 = vadd.f32 %v3446_v57, %v246_v58 }
 0x244   :  { %261 = vrot.lane.b32.xlu1 %v247_v59, %s3479_s29 }
 0x249   :  { %v248_v60 = vpop.f32.mrf.mxu3 }
 0x24a   :  { %v249_v0 = vadd.f32 %v3446_v57, %v248_v60 }
 0x24c   :  { %v3438_v16 = vpack.i.bf16 %v247_v59, %v249_v0 }
 0x251   :  { %v251_v61 = vpop.f32.mrf.mxu3 }
 0x252   :  { %v252_v62 = vadd.f32 %v3446_v57, %v251_v61 }
 0x254   :  { %265 = vrot.lane.b32.xlu0 %v252_v62, %s3479_s29 }
 0x259   :  { %v253_v63 = vpop.f32.mrf.mxu3 }
 0x25c   :  { %263 = vrot.lane.b32.xlu0 %v249_v0, %s3479_s29 }
 0x2b6   :  { %v262_v3 = vpop.permute.xlu1 %261 }
 0x2c6   :  { %v266_v1 = vpop.permute.xlu0 %265 }
 0x2c7   :  { %2574 = vmatpush.xpose.msk.msrb.mxu0 %vm175_vm3, %v266_v1 }
 0x2ce   :  { %v264_v2 = vpop.permute.xlu0 %263 }
 0x2cf   :  { %2575 = vmatpush.xpose.msk.msrb.mxu0 %vm175_vm3, %v264_v2 }
 0x2d3   :  { %2576 = vmatpush.xpose.msk.msrb.mxu0 %vm175_vm3, %v262_v3 }
 0x2d6   :  { %2577 = vmatmul.msk.f32.vlgmr.msrb.gmra.mxu0 %vm175_vm3, %v247_v59 }
 0x2de   :  { %2578 = vmatmul.msk.f32.gmra.mxu0 %vm175_vm3, %v249_v0 }
 0x2e6   :  { %2579 = vmatmul.msk.f32.gmra.mxu0 %vm175_vm3, %v252_v62 }
 0x353   :  { %v296_v5 = vpop.f32.mrf.mxu0 }
 0x354   :  { %v297_v6 = vadd.f32 %v296_v5, %v255_v4 }
 0x356   :  { %v306_v7 = vsel %vm305_vm4, %v297_v6, -inf }
 0x357   :  { %307 = vmax.xlane.f32.xlu1 %v306_v7 }
 0x35b   :  { %v299_v9 = vpop.f32.mrf.mxu0 }
 0x35c   :  { %v300_v10 = vadd.f32 %v299_v9, %v256_v8 }
 0x35e   :  { %v309_v11 = vsel %vm305_vm4, %v300_v10, -inf }
 0x35f   :  { %310 = vmax.xlane.f32.xlu2 %v309_v11 }
 0x363   :  { %v302_v13 = vpop.f32.mrf.mxu0 }
 0x364   :  { %v303_v14 = vadd.f32 %v302_v13, %v257_v12 }
 0x366   :  { %v313_v15 = vsel %vm312_vm5, %v303_v14, -inf }
 0x367   :  { %314 = vmax.xlane.f32.xlu2 %v313_v15 }
 0x37f   :  { %344 = vrot.lane.b32.xlu2 %v252_v62, %s3480_s8 }
 0x387   :  { %3439 = vrot.lane.b32.xlu2 %v3438_v16, %s3480_s8 }
 0x3ca   :  { %v308_v17 = vpop.xlane.xlu1 %307 }
 0x3cb   :  { %v316_v18 = vsub.f32 %v297_v6, %v308_v17 }
 0x3cd   :  { %v319_v19 = vmul.f32 1.442695, %v316_v18 }
 0x3cf   :  { %3453 = vpow2.f32 %v319_v19 }
 0x3d2   :  { %v311_v20 = vpop.xlane.xlu2 %310 }
 0x3d3   :  { %v317_v21 = vsub.f32 %v300_v10, %v311_v20 }
 0x3d5   :  { %v3454_v22 = vpop.eup %3453  ;;  %v321_v23 = vmul.f32 1.442695, %v317_v21 }
 0x3d6   :  { %v325_v24 = vsel %vm305_vm4, %v3454_v22, 0.0 }
 0x3d7   :  { %3455 = vpow2.f32 %v321_v23  ;;  %326 = vadd.xlane.f32.xlu0 %v325_v24  ;;  %v2612_v24 = vld [vmem:[%s4534_s15 + $0x80] sm:$0xf] }
 0x3da   :  { %v315_v25 = vpop.xlane.xlu2 %314 }
 0x3db   :  { %v318_v26 = vsub.f32 %v303_v14, %v315_v25  ;;  %v3279_v25 = vld [vmem:[%s4534_s15 + $0xbc] sm:$0xf0] }
 0x3dd   :  { %v3456_v27 = vpop.eup %3455  ;;  %v323_v28 = vmul.f32 1.442695, %v318_v26  ;;  %v3278_v26 = vld [vmem:[%s4534_s15 + $0x8c] sm:$0xf] }
 0x3de   :  { %v328_v29 = vsel %vm305_vm4, %v3456_v27, 0.0 }
 0x3df   :  { %3457 = vpow2.f32 %v323_v28  ;;  %329 = vadd.xlane.f32.xlu2 %v328_v29  ;;  %v2622_v28 = vld [vmem:[%s4534_s15 + $0xc8] sm:$0xf0]  ;;  %v3277_v29 = vld [vmem:[%s4534_s15 + $0x84] sm:$0xf] }
 0x3e2   :  { %v345_v30 = vpop.permute.xlu2 %344 }
 0x3e3   :  { %2580 = vmatpush.msk.msrb.mxu1 %vm357_vm6, %v345_v30  ;;  %v2614_v30 = vld [vmem:[%s4534_s15 + $0xc0] sm:$0xf0] }
 0x3e5   :  { %v3458_v31 = vpop.eup %3457 }
 0x3e6   :  { %v331_v32 = vsel %vm312_vm5, %v3458_v31, 0.0 }
 0x3e7   :  { %332 = vadd.xlane.f32.xlu1 %v331_v32  ;;  %v2617_v32 = vor.u32 %v3277_v29, %v2614_v30  ;;  %v2638_v29 = vld [vmem:[%s4534_s15 + $0x50] sm:$0xf0]  ;;  %v2644_v30 = vld [vmem:[%s4534_s15 + $0x18] sm:$0xf] }
 0x3e9   :  { %613 = vmatpush.bf16.msra.mxu0 %v2617_v32 }
 0x3ea   :  { %v3440_v33 = vpop.permute.xlu2 %3439 }
 0x3eb   :  { %v3441_v34 = vunpack.i.l.bf16 %v3440_v33  ;;  %v3442_v35 = vunpack.i.h.bf16 %v3440_v33  ;;  %v2620_v33 = vld [vmem:[%s4534_s15 + $0x88] sm:$0xf] }
 0x3ed   :  { %374 = vmatpush.msrb.mxu1 %v3441_v34  ;;  %v3280_v34 = vld [vmem:[%s4534_s15 + $0xc4] sm:$0xf0] }
 0x3ef   :  { %375 = vmatpush.msrb.mxu1 %v3442_v35 }
 0x44a   :  { %v327_v36 = vpop.xlane.xlu0 %326 }
 0x44b   :  { %3459 = vrcp.f32 %v327_v36  ;;  %v2621_v36 = vor.u32 %v3280_v34, %v2620_v33  ;;  %v3316_v33 = vld [vmem:[%s4534_s15 + $0x54] sm:$0xf0]  ;;  %v3314_v34 = vld [vmem:[%s4534_s15 + $0x1c] sm:$0xf] }
 0x44d   :  { %631 = vmatpush.bf16.msra.mxu1 %v2621_v36 }
 0x451   :  { %v3460_v37 = vpop.eup %3459 }
 0x452   :  { %v330_v38 = vpop.xlane.xlu2 %329  ;;  %v337_v39 = vmul.f32 %v3460_v37, %v3454_v22 }
 0x453   :  { %3461 = vrcp.f32 %v330_v38  ;;  %v2596_v38 = vld [vmem:[%s4534_s15] sm:$0xf] }
 0x454   :  { %2581 = vmatmul.msk.f32.vlgmr.msrb.gmra.mxu1 %vm305_vm4, %v337_v39  ;;  %v3275_v39 = vld [vmem:[%s4534_s15 + $0x3c] sm:$0xf0] }
 0x459   :  { %v3462_v40 = vpop.eup %3461 }
 0x45a   :  { %v333_v41 = vpop.xlane.xlu1 %332  ;;  %v338_v42 = vmul.f32 %v3462_v40, %v3456_v27  ;;  %v2613_v27 = vor.u32 %v3279_v25, %v2612_v24  ;;  %v3273_v40 = vld [vmem:[%s4534_s15 + $0x4] sm:$0xf]  ;;  %v2636_v24 = vld [vmem:[%s4534_s15 + $0x10] sm:$0xf] }
 0x45b   :  { %3463 = vrcp.f32 %v333_v41  ;;  %v2597_v41 = vor.u32 %v3275_v39, %v2596_v38  ;;  %v3315_v25 = vld [vmem:[%s4534_s15 + $0x4c] sm:$0xf0]  ;;  %v2646_v38 = vld [vmem:[%s4534_s15 + $0x58] sm:$0xf0]  ;;  %v3449_v39 = vld [vmem:[%s4533_s14] ss:$0 sm:$0xff] }
 0x45c   :  { %2582 = vmatmul.msk.f32.gmra.mxu1 %vm305_vm4, %v338_v42  ;;  %595 = vmatpush.bf16.msra.mxu3 %v2613_v27  ;;  %v2598_v42 = vld [vmem:[%s4534_s15 + $0x40] sm:$0xf0] }
 0x45d   :  { %v2601_v46 = vor.u32 %v3273_v40, %v2598_v42  ;;  %v2649_v42 = vor.u32 %v3314_v34, %v2646_v38  ;;  %v3321_v34 = vld [vmem:[%s4535_s17 + $0x100] sm:$0xff]  ;;  %v3288_v38 = vld [vmem:[%s4535_s17 + $0x38] sm:$0xff] }
 0x45f   :  { %614 = vmatpush.bf16.msra.mxu0 %v2601_v46 }
 0x460   :  { %596 = vmatpush.bf16.msra.mxu3 %v2597_v41 }
 0x461   :  { %v3464_v43 = vpop.eup %3463 }
 0x462   :  { %v339_v44 = vmul.f32 %v3464_v43, %v3458_v31  ;;  %v2625_v31 = vor.u32 %v3278_v26, %v2622_v28  ;;  %v2604_v43 = vld [vmem:[%s4534_s15 + $0x8] sm:$0xf]  ;;  %v3313_v28 = vld [vmem:[%s4534_s15 + $0x14] sm:$0xf] }
 0x463   :  { %v2641_v32 = vor.u32 %v3313_v28, %v2638_v29 }
 0x464   :  { %2583 = vmatmul.msk.f32.gmra.mxu1 %vm305_vm4, %v339_v44  ;;  %649 = vmatpush.bf16.msra.mxu2 %v2625_v31  ;;  %v3276_v44 = vld [vmem:[%s4534_s15 + $0x44] sm:$0xf0]  ;;  %v2637_v31 = vor.u32 %v3315_v25, %v2636_v24  ;;  %v3347_v24 = vld [vmem:[%s4535_s17 + $0x1d0] sm:$0xff]  ;;  %v3329_v25 = vld [vmem:[%s4535_s17 + $0x140] sm:$0xff] }
 0x4d1   :  { %v377_v47 = vpop.f32.mrf.mxu1 }
 0x4d9   :  { %v380_v50 = vpop.f32.mrf.mxu1 }
 0x4da   :  { %v390_v51 = vpack.c.bf16 %v380_v50, %v377_v47  ;;  %v2605_v47 = vor.u32 %v3276_v44, %v2604_v43  ;;  %v3274_v50 = vld [vmem:[%s4534_s15 + $0xc] sm:$0xf] }
 0x4dc   :  { %2592 = vmatmul.msk.bf16.vlgmr.msrb.gmra.mxu2 %vm175_vm3, %v390_v51  ;;  %v2606_v51 = vld [vmem:[%s4534_s15 + $0x48] sm:$0xf0]  ;;  %632 = vmatpush.bf16.msra.mxu1 %v2605_v47 }
 0x4e1   :  { %v383_v52 = vpop.f32.mrf.mxu1 }
 0x4e2   :  { %v391_v53 = vpack.c.bf16 %v383_v52, %v383_v52  ;;  %v2609_v52 = vor.u32 %v3274_v50, %v2606_v51 }
 0x4e4   :  { %650 = vmatpush.bf16.msra.mxu2 %v2609_v52 }
 0x4ec   :  { %2593 = vmatmul.msk.bf16.gmra.mxu2 %vm175_vm3, %v391_v53 }
 0x55f   :  { %v423_v56 = vpop.f32.mrf.mxu2 }
 0x560   :  { %v424_v57 = vadd.f32 %v3447_v54, %v423_v56 }
 0x562   :  { %v432_v58 = vadd.f32 %v424_v57, %v3636_v48  ;;  %v3481_v48 = vmov 32.0  }
 0x563   :  { %3465 = vrcp.f32 %v3481_v48  ;;  %v3350_v48 = vld [vmem:[%s4535_s17 + $0x1e8] sm:$0xff] }
 0x564   :  { %v435_v59 = vsel %vm175_vm3, %v432_v58, 0.0 }
 0x565   :  { %436 = vadd.xlane.f32.xlu0 %v435_v59 }
 0x567   :  { %v425_v60 = vpop.f32.mrf.mxu2 }
 0x568   :  { %v426_v61 = vadd.f32 %v3447_v54, %v425_v60 }
 0x569   :  { %v3466_v5 = vpop.eup %3465 }
 0x56a   :  { %v433_v62 = vadd.f32 %v426_v61, %v3638_v49  ;;  %v446_v6 = vmul.f32 32.0, %v3466_v5  ;;  %vm450_vm8 = vweird.f32 %v3466_v5 }
 0x56c   :  { %v438_v63 = vsel %vm175_vm3, %v433_v62, 0.0  ;;  %v447_v7 = vsub.f32 1.0, %v446_v6 }
 0x56d   :  { %439 = vadd.xlane.f32.xlu1 %v438_v63 }
 0x56e   :  { %v448_v8 = vmul.f32 %v3466_v5, %v447_v7  ;;  %v2652_v7 = vld [vmem:[%s4534_s15 + $0x90] sm:$0xf] }
 0x56f   :  { %v428_v0 = vpop.f32.mrf.mxu2 }
 0x570   :  { %v429_v1 = vadd.f32 %v3447_v54, %v428_v0  ;;  %v449_v9 = vadd.f32 %v3466_v5, %v448_v8  ;;  %v3319_v8 = vld [vmem:[%s4534_s15 + $0xcc] sm:$0xf0] }
 0x572   :  { %v434_v2 = vadd.f32 %v429_v1, %v3646_v55  ;;  %v3695_v49 = vsel %vm450_vm8, %v3466_v5, %v449_v9  ;;  %v3448_v9 = vld [vmem:[%s4532_s13] ss:$0 sm:$0xff] }
 0x574   :  { %v442_v3 = vsel %vm441_vm7, %v434_v2, 0.0 }
 0x575   :  { %443 = vadd.xlane.f32.xlu0 %v442_v3 }
 0x577   :  { %v430_v4 = vpop.f32.mrf.mxu2 }
 0x5d8   :  { %v437_v10 = vpop.xlane.xlu0 %436 }
 0x5d9   :  { %v452_v11 = vmul.f32 %v3695_v49, %v437_v10  ;;  %v2653_v10 = vor.u32 %v3319_v8, %v2652_v7 }
 0x5db   :  { %v3698_v12 = vsub.f32 %v432_v58, %v452_v11  ;;  %v3318_v11 = vld [vmem:[%s4534_s15 + $0x9c] sm:$0xf]  ;;  %809 = vmatpush.bf16.msrb.mxu3 %v2653_v10  ;;  %v3349_v10 = vld [vmem:[%s4535_s17 + $0x1e0] sm:$0xff] }
 0x5dd   :  { %v458_v55 = vmul.f32 %v3698_v12, %v3698_v12 }
 0x5df   :  { %v461_v13 = vsel %vm175_vm3, %v458_v55, 0.0  ;;  %v2662_v55 = vld [vmem:[%s4534_s15 + $0xd8] sm:$0xf0]  ;;  %810 = vmatpush.bf16.msrb.mxu3 %v2637_v31 }
 0x5e0   :  { %462 = vadd.xlane.f32.xlu1 %v461_v13  ;;  %v440_v14 = vpop.xlane.xlu1 %439  ;;  %v3317_v13 = vld [vmem:[%s4534_s15 + $0x94] sm:$0xf]  ;;  %v3304_v31 = vld [vmem:[%s4535_s17 + $0xb8] sm:$0xff] }
 0x5e1   :  { %v453_v15 = vmul.f32 %v3695_v49, %v440_v14 }
 0x5e3   :  { %v3704_v16 = vsub.f32 %v433_v62, %v453_v15  ;;  %v2665_v15 = vor.u32 %v3318_v11, %v2662_v55  ;;  %v3331_v11 = vld [vmem:[%s4535_s17 + $0x150] sm:$0xff] }
 0x5e4   :  { %v3339_v55 = vld [vmem:[%s4535_s17 + $0x190] sm:$0xff] }
 0x5e5   :  { %v459_v17 = vmul.f32 %v3704_v16, %v3704_v16  ;;  %863 = vmatpush.bf16.msrb.mxu2 %v2665_v15 }
 0x5e7   :  { %v464_v18 = vsel %vm175_vm3, %v459_v17, 0.0  ;;  %v2654_v17 = vld [vmem:[%s4534_s15 + $0xd0] sm:$0xf0] }
 0x5e8   :  { %v444_v19 = vpop.xlane.xlu0 %443  ;;  %465 = vadd.xlane.f32.xlu0 %v464_v18  ;;  %v2660_v18 = vld [vmem:[%s4534_s15 + $0x98] sm:$0xf] }
 0x5e9   :  { %v454_v20 = vmul.f32 %v3695_v49, %v444_v19  ;;  %864 = vmatpush.bf16.msrb.mxu2 %v2649_v42  ;;  %v3294_v42 = vld [vmem:[%s4535_s17 + $0x68] sm:$0xff] }
 0x5eb   :  { %v3710_v21 = vsub.f32 %v434_v2, %v454_v20 }
 0x5ed   :  { %v460_v22 = vmul.f32 %v3710_v21, %v3710_v21 }
 0x5ef   :  { %v467_v23 = vsel %vm441_vm7, %v460_v22, 0.0  ;;  %v2657_v22 = vor.u32 %v3317_v13, %v2654_v17  ;;  %v3324_v13 = vld [vmem:[%s4535_s17 + $0x118] sm:$0xff] }
 0x5f0   :  { %468 = vadd.xlane.f32.xlu1 %v467_v23  ;;  %v3320_v23 = vld [vmem:[%s4534_s15 + $0xd4] sm:$0xf0] }
 0x5f1   :  { %827 = vmatpush.bf16.msrb.mxu0 %v2657_v22 }
 0x5f5   :  { %828 = vmatpush.bf16.msrb.mxu0 %v2641_v32 }
 0x653   :  { %v463_v35 = vpop.xlane.xlu1 %462 }
 0x654   :  { %v470_v37 = vmul.f32 %v463_v35, %v3695_v49 }
 0x656   :  { %v473_v45 = vadd.f32 1e-05, %v470_v37  ;;  %v2645_v37 = vor.u32 %v3316_v33, %v2644_v30  ;;  %v3296_v30 = vld [vmem:[%s4535_s17 + $0x78] sm:$0xff] }
 0x658   :  { %3467 = vrsqrt.f32 %v473_v45  ;;  %vm482_vm10 = vweird.f32 %v473_v45 }
 0x65b   :  { %v466_v53 = vpop.xlane.xlu0 %465 }
 0x65c   :  { %v471_v54 = vmul.f32 %v466_v53, %v3695_v49 }
 0x65e   :  { %v3468_v56 = vpop.eup %3467  ;;  %v474_v57 = vadd.f32 1e-05, %v471_v54 }
 0x65f   :  { %v477_v58 = vmul.f32 %v3468_v56, %v473_v45  ;;  %vm483_vm9 = vweird.f32 %v3468_v56 }
 0x660   :  { %3469 = vrsqrt.f32 %v474_v57  ;;  %vm3769_vm11 = vmor %vm482_vm10, %vm483_vm9  ;;  %vm492_vm13 = vweird.f32 %v474_v57 }
 0x661   :  { %v478_v59 = vmul.f32 %v3468_v56, %v477_v58  ;;  %v3335_v58 = vld [vmem:[%s4535_s17 + $0x170] sm:$0xff] }
 0x663   :  { %v479_v60 = vmul.f32 0.5, %v478_v59  ;;  %v469_v61 = vpop.xlane.xlu1 %468  ;;  %v3343_v59 = vld [vmem:[%s4535_s17 + $0x1b0] sm:$0xff] }
 0x664   :  { %v472_v62 = vmul.f32 %v469_v61, %v3695_v49  ;;  %v3352_v61 = vld [vmem:[%s4535_s17 + $0x1f8] sm:$0xff] }
 0x665   :  { %v480_v63 = vsub.f32 1.5, %v479_v60  ;;  %v3328_v60 = vld [vmem:[%s4535_s17 + $0x138] sm:$0xff] }
 0x666   :  { %v3470_v0 = vpop.eup %3469  ;;  %v3766_v1 = vadd.f32 1e-05, %v472_v62  ;;  %v3334_v62 = vld [vmem:[%s4535_s17 + $0x168] sm:$0xff] }
 0x667   :  { %v481_v2 = vmul.f32 %v3468_v56, %v480_v63  ;;  %v487_v3 = vmul.f32 %v3470_v0, %v474_v57  ;;  %vm493_vm12 = vweird.f32 %v3470_v0  ;;  %v3344_v57 = vld [vmem:[%s4535_s17 + $0x1b8] sm:$0xff]  ;;  %v3342_v63 = vld [vmem:[%s4535_s17 + $0x1a8] sm:$0xff] }
 0x668   :  { %3471 = vrsqrt.f32 %v3766_v1  ;;  %vm494_vm14 = vmor %vm492_vm13, %vm493_vm12  ;;  %vm502_vm0 = vweird.f32 %v3766_v1 }
 0x669   :  { %v488_v4 = vmul.f32 %v3470_v0, %v487_v3  ;;  %v485_v5 = vsel %vm3769_vm11, %v3468_v56, %v481_v2  ;;  %v3333_v2 = vld [vmem:[%s4535_s17 + $0x160] sm:$0xff] }
 0x66a   :  { %v506_v20 = vmul.f32 %v485_v5, %v3698_v12  ;;  %v2661_v12 = vor.u32 %v3320_v23, %v2660_v18  ;;  %v3341_v3 = vld [vmem:[%s4535_s17 + $0x1a0] sm:$0xff]  ;;  %v3332_v5 = vld [vmem:[%s4535_s17 + $0x158] sm:$0xff]  ;;  %v3330_v18 = vld [vmem:[%s4535_s17 + $0x148] sm:$0xff] }
 0x66b   :  { %v489_v6 = vmul.f32 0.5, %v488_v4  ;;  %v3326_v4 = vld [vmem:[%s4535_s17 + $0x128] sm:$0xff]  ;;  %v3323_v23 = vld [vmem:[%s4535_s17 + $0x110] sm:$0xff] }
 0x66c   :  { %845 = vmatpush.bf16.msrb.mxu1 %v2661_v12  ;;  %v513_v40 = vmul.f32 %v3448_v9, %v506_v20  ;;  %v3346_v12 = vld [vmem:[%s4535_s17 + $0x1c8] sm:$0xff] }
 0x66d   :  { %v490_v14 = vsub.f32 1.5, %v489_v6  ;;  %v3340_v6 = vld [vmem:[%s4535_s17 + $0x198] sm:$0xff] }
 0x66e   :  { %v3472_v19 = vpop.eup %3471  ;;  %v3833_v46 = vadd.f32 %v3449_v39, %v513_v40 }
 0x66f   :  { %v491_v26 = vmul.f32 %v3470_v0, %v490_v14  ;;  %v497_v27 = vmul.f32 %v3472_v19, %v3766_v1  ;;  %vm503_vm15 = vweird.f32 %v3472_v19  ;;  %v3351_v1 = vld [vmem:[%s4535_s17 + $0x1f0] sm:$0xff]  ;;  %v3348_v14 = vld [vmem:[%s4535_s17 + $0x1d8] sm:$0xff] }
 0x670   :  { %846 = vmatpush.bf16.msrb.mxu1 %v2645_v37  ;;  %vm504_vm1 = vmor %vm502_vm0, %vm503_vm15  ;;  %v3303_v37 = vld [vmem:[%s4535_s17 + $0xb0] sm:$0xff] }
 0x671   :  { %v495_v35 = vsel %vm494_vm14, %v3470_v0, %v491_v26  ;;  %v498_v36 = vmul.f32 %v3472_v19, %v497_v27  ;;  %v3327_v0 = vld [vmem:[%s4535_s17 + $0x130] sm:$0xff]  ;;  %v3337_v26 = vld [vmem:[%s4535_s17 + $0x180] sm:$0xff]  ;;  %v3322_v27 = vld [vmem:[%s4535_s17 + $0x108] sm:$0xff] }
 0x672   :  { %v507_v41 = vmul.f32 %v495_v35, %v3704_v16  ;;  %v3345_v35 = vld [vmem:[%s4535_s17 + $0x1c0] sm:$0xff] }
 0x673   :  { %v499_v43 = vmul.f32 0.5, %v498_v36  ;;  %v3295_v36 = vld [vmem:[%s4535_s17 + $0x70] sm:$0xff] }
 0x674   :  { %v514_v44 = vmul.f32 %v3448_v9, %v507_v41 }
 0x675   :  { %v500_v45 = vsub.f32 1.5, %v499_v43  ;;  %v3302_v43 = vld [vmem:[%s4535_s17 + $0xa8] sm:$0xff] }
 0x676   :  { %v3835_v47 = vadd.f32 %v3449_v39, %v514_v44 }
 0x677   :  { %v501_v50 = vmul.f32 %v3472_v19, %v500_v45 }
 0x678   :  { %v3840_v51 = vpack.c.bf16 %v3835_v47, %v3833_v46 }
 0x679   :  { %v505_v16 = vsel %vm504_vm1, %v3472_v19, %v501_v50  ;;  %v3338_v19 = vld [vmem:[%s4535_s17 + $0x188] sm:$0xff]  ;;  %v3287_v50 = vld [vmem:[%s4535_s17 + $0x30] sm:$0xff] }
 0x67a   :  { %2626 = vmatmul.msk.bf16.vlgmr.msra.gmra.mxu3 %vm175_vm3, %v3840_v51  ;;  %2628 = vmatmul.msk.bf16.vlgmr.msra.gmra.mxu0 %vm175_vm3, %v3840_v51  ;;  %v508_v52 = vmul.f32 %v505_v16, %v3710_v21  ;;  %v3336_v21 = vld [vmem:[%s4535_s17 + $0x178] sm:$0xff]  ;;  %v3311_v16 = vld [vmem:[%s4535_s17 + $0xf0] sm:$0xff] }
 0x67b   :  { %2630 = vmatmul.msk.bf16.vlgmr.msra.gmra.mxu1 %vm175_vm3, %v3840_v51  ;;  %2632 = vmatmul.msk.bf16.vlgmr.msra.gmra.mxu2 %vm175_vm3, %v3840_v51 }
 0x67c   :  { %v515_v53 = vmul.f32 %v3448_v9, %v508_v52  ;;  %1169 = vmatpush.bf16.msra.mxu0 %v3336_v21  ;;  %1187 = vmatpush.bf16.msra.mxu1 %v3344_v57  ;;  %v3325_v9 = vld [vmem:[%s4535_s17 + $0x120] sm:$0xff]  ;;  %v3286_v21 = vld [vmem:[%s4535_s17 + $0x28] sm:$0xff] }
 0x67d   :  { %1151 = vmatpush.bf16.msra.mxu3 %v3328_v60  ;;  %1205 = vmatpush.bf16.msra.mxu2 %v3352_v61  ;;  %v3293_v52 = vld [vmem:[%s4535_s17 + $0x60] sm:$0xff]  ;;  %v3310_v57 = vld [vmem:[%s4535_s17 + $0xe8] sm:$0xff]  ;;  %v3292_v60 = vld [vmem:[%s4535_s17 + $0x58] sm:$0xff] }
 0x67e   :  { %v3851_v54 = vadd.f32 %v3449_v39, %v515_v53  ;;  %v3312_v39 = vld [vmem:[%s4535_s17 + $0xf8] sm:$0xff]  ;;  %v3301_v53 = vld [vmem:[%s4535_s17 + $0xa0] sm:$0xff] }
 0x67f   :  { %v3300_v61 = vld [vmem:[%s4535_s17 + $0x98] sm:$0xff] }
 0x680   :  { %v3855_v56 = vpack.c.bf16 %v3851_v54, %v3851_v54  ;;  %1170 = vmatpush.bf16.msra.mxu0 %v3335_v58  ;;  %1188 = vmatpush.bf16.msra.mxu1 %v3343_v59 }
 0x681   :  { %1152 = vmatpush.bf16.msra.mxu3 %v3327_v0  ;;  %1206 = vmatpush.bf16.msra.mxu2 %v3351_v1  ;;  %v3285_v0 = vld [vmem:[%s4535_s17 + $0x20] sm:$0xff] }
 0x682   :  { %v3309_v1 = vld [vmem:[%s4535_s17 + $0xe0] sm:$0xff] }
 0x684   :  { %1171 = vmatpush.bf16.msra.mxu0 %v3334_v62  ;;  %1189 = vmatpush.bf16.msra.mxu1 %v3342_v63  ;;  %v753_v62 = vld [vmem:[%s4536_s16 + $0x4] sm:$0xf] }
 0x685   :  { %1153 = vmatpush.bf16.msra.mxu3 %v3326_v4  ;;  %1207 = vmatpush.bf16.msra.mxu2 %v3350_v48  ;;  %v3299_v4 = vld [vmem:[%s4535_s17 + $0x90] sm:$0xff]  ;;  %v756_v48 = vperm.slane %v753_v62, 1 }
 0x688   :  { %1172 = vmatpush.bf16.msra.mxu0 %v3333_v2  ;;  %1190 = vmatpush.bf16.msra.mxu1 %v3341_v3  ;;  %v3291_v3 = vld [vmem:[%s4535_s17 + $0x50] sm:$0xff] }
 0x689   :  { %1154 = vmatpush.bf16.msra.mxu3 %v3325_v9  ;;  %1208 = vmatpush.bf16.msra.mxu2 %v3349_v10  ;;  %v3308_v9 = vld [vmem:[%s4535_s17 + $0xd8] sm:$0xff] }
 0x68a   :  { %2627 = vmatmul.msk.bf16.gmra.mxu3 %vm175_vm3, %v3855_v56  ;;  %2629 = vmatmul.msk.bf16.gmra.mxu0 %vm175_vm3, %v3855_v56 }
 0x68b   :  { %2631 = vmatmul.msk.bf16.gmra.mxu1 %vm175_vm3, %v3855_v56  ;;  %2633 = vmatmul.msk.bf16.gmra.mxu2 %vm175_vm3, %v3855_v56 }
 0x68c   :  { %1173 = vmatpush.bf16.msra.mxu0 %v3332_v5  ;;  %1191 = vmatpush.bf16.msra.mxu1 %v3340_v6  ;;  %v757_v5 = vperm.slane %v753_v62, 2  ;;  %v3284_v6 = vld [vmem:[%s4535_s17 + $0x18] sm:$0xff] }
 0x68d   :  { %1155 = vmatpush.bf16.msra.mxu3 %v3324_v13  ;;  %1209 = vmatpush.bf16.msra.mxu2 %v3348_v14 }
 0x690   :  { %1174 = vmatpush.bf16.msra.mxu0 %v3331_v11  ;;  %1192 = vmatpush.bf16.msra.mxu1 %v3339_v55  ;;  %v3290_v11 = vld [vmem:[%s4535_s17 + $0x48] sm:$0xff] }
 0x691   :  { %1156 = vmatpush.bf16.msra.mxu3 %v3323_v23  ;;  %1210 = vmatpush.bf16.msra.mxu2 %v3347_v24  ;;  %v3298_v55 = vld [vmem:[%s4535_s17 + $0x88] sm:$0xff] }
 0x694   :  { %1175 = vmatpush.bf16.msra.mxu0 %v3330_v18  ;;  %1193 = vmatpush.bf16.msra.mxu1 %v3338_v19  ;;  %v3283_v18 = vld [vmem:[%s4535_s17 + $0x10] sm:$0xff] }
 0x695   :  { %1157 = vmatpush.bf16.msra.mxu3 %v3322_v27  ;;  %1211 = vmatpush.bf16.msra.mxu2 %v3346_v12  ;;  %v3307_v19 = vld [vmem:[%s4535_s17 + $0xd0] sm:$0xff]  ;;  %v3289_v12 = vld [vmem:[%s4535_s17 + $0x40] sm:$0xff] }
 0x698   :  { %1176 = vmatpush.bf16.msra.mxu0 %v3329_v25  ;;  %1194 = vmatpush.bf16.msra.mxu1 %v3337_v26  ;;  %v755_v25 = vperm.slane %v753_v62, 0 }
 0x699   :  { %1158 = vmatpush.bf16.msra.mxu3 %v3321_v34  ;;  %1212 = vmatpush.bf16.msra.mxu2 %v3345_v35 }
 0x69a   :  { %2666 = vmatmul.msk.bf16.vlgmr.msrb.gmra.mxu3 %vm175_vm3, %v3840_v51  ;;  %2668 = vmatmul.msk.bf16.vlgmr.msrb.gmra.mxu0 %vm175_vm3, %v3840_v51 }
 0x69b   :  { %2670 = vmatmul.msk.bf16.vlgmr.msrb.gmra.mxu1 %vm175_vm3, %v3840_v51  ;;  %2672 = vmatmul.msk.bf16.vlgmr.msrb.gmra.mxu2 %vm175_vm3, %v3840_v51 }
 0x69c   :  { %1433 = vmatpush.bf16.msrb.mxu0 %v3296_v30  ;;  %1451 = vmatpush.bf16.msrb.mxu1 %v3304_v31  ;;  %v3297_v30 = vld [vmem:[%s4535_s17 + $0x80] sm:$0xff]  ;;  %v758_v31 = vperm.slane %v753_v62, 3 }
 0x69d   :  { %1415 = vmatpush.bf16.msrb.mxu3 %v3288_v38  ;;  %1469 = vmatpush.bf16.msrb.mxu2 %v3312_v39 }
 0x6a0   :  { %1434 = vmatpush.bf16.msrb.mxu0 %v3295_v36  ;;  %1452 = vmatpush.bf16.msrb.mxu1 %v3303_v37  ;;  %v3282_v37 = vld [vmem:[%s4535_s17 + $0x8] sm:$0xff] }
 0x6a1   :  { %1416 = vmatpush.bf16.msrb.mxu3 %v3287_v50  ;;  %1470 = vmatpush.bf16.msrb.mxu2 %v3311_v16 }
 0x6a4   :  { %1435 = vmatpush.bf16.msrb.mxu0 %v3294_v42  ;;  %1453 = vmatpush.bf16.msrb.mxu1 %v3302_v43  ;;  %v3306_v42 = vld [vmem:[%s4535_s17 + $0xc8] sm:$0xff] }
 0x6a5   :  { %1417 = vmatpush.bf16.msrb.mxu3 %v3286_v21  ;;  %1471 = vmatpush.bf16.msrb.mxu2 %v3310_v57 }
 0x6a8   :  { %1436 = vmatpush.bf16.msrb.mxu0 %v3293_v52  ;;  %1454 = vmatpush.bf16.msrb.mxu1 %v3301_v53 }
 0x6a9   :  { %1418 = vmatpush.bf16.msrb.mxu3 %v3285_v0  ;;  %1472 = vmatpush.bf16.msrb.mxu2 %v3309_v1 }
 0x6aa   :  { %2667 = vmatmul.msk.bf16.gmra.mxu3 %vm175_vm3, %v3855_v56  ;;  %2669 = vmatmul.msk.bf16.gmra.mxu0 %vm175_vm3, %v3855_v56 }
 0x6ab   :  { %2671 = vmatmul.msk.bf16.gmra.mxu1 %vm175_vm3, %v3855_v56  ;;  %2673 = vmatmul.msk.bf16.gmra.mxu2 %vm175_vm3, %v3855_v56 }
 0x6ac   :  { %1437 = vmatpush.bf16.msrb.mxu0 %v3292_v60  ;;  %1455 = vmatpush.bf16.msrb.mxu1 %v3300_v61 }
 0x6ad   :  { %1419 = vmatpush.bf16.msrb.mxu3 %v3284_v6  ;;  %1473 = vmatpush.bf16.msrb.mxu2 %v3308_v9 }
 0x6b0   :  { %1438 = vmatpush.bf16.msrb.mxu0 %v3291_v3  ;;  %1456 = vmatpush.bf16.msrb.mxu1 %v3299_v4 }
 0x6b1   :  { %1420 = vmatpush.bf16.msrb.mxu3 %v3283_v18  ;;  %1474 = vmatpush.bf16.msrb.mxu2 %v3307_v19  ;;  %v533_v18 = vld [vmem:[%s4536_s16] sm:$0xf] }
 0x6b4   :  { %1439 = vmatpush.bf16.msrb.mxu0 %v3290_v11  ;;  %1457 = vmatpush.bf16.msrb.mxu1 %v3298_v55 }
 0x6b5   :  { %1421 = vmatpush.bf16.msrb.mxu3 %v3282_v37  ;;  %1475 = vmatpush.bf16.msrb.mxu2 %v3306_v42  ;;  %v4109_v37 = vperm.slane %v533_v18, 3  ;;  %v3357_v42 = vld [vmem:[%s4534_s15 + $0xa4] sm:$0xf] }
 0x6b8   :  { %1440 = vmatpush.bf16.msrb.mxu0 %v3289_v12  ;;  %1458 = vmatpush.bf16.msrb.mxu1 %v3297_v30 }
 0x6f7   :  { %v3929_v7 = vpop.f32.mrf.mxu0 }
 0x6f8   :  { %v3931_v8 = vpop.f32.mrf.mxu1 }
 0x6fd   :  { %v3951_v15 = vpop.f32.mrf.mxu3 }
 0x6fe   :  { %v3953_v17 = vpop.f32.mrf.mxu2 }
 0x6ff   :  { %v3961_v20 = vpop.f32.mrf.mxu0 }
 0x700   :  { %v3963_v22 = vpop.f32.mrf.mxu1 }
 0x705   :  { %v3983_v28 = vpop.f32.mrf.mxu3 }
 0x706   :  { %v3985_v29 = vpop.f32.mrf.mxu2 }
 0x707   :  { %v3993_v32 = vpop.f32.mrf.mxu0 }
 0x708   :  { %v3995_v33 = vpop.f32.mrf.mxu1 }
 0x70d   :  { %v4015_v40 = vpop.f32.mrf.mxu3 }
 0x70e   :  { %v4017_v41 = vpop.f32.mrf.mxu2 }
 0x70f   :  { %v623_v44 = vpop.f32.mrf.mxu0 }
 0x710   :  { %v641_v45 = vpop.f32.mrf.mxu1 }
 0x715   :  { %v605_v58 = vpop.f32.mrf.mxu3 }
 0x716   :  { %v659_v59 = vpop.f32.mrf.mxu2  ;;  %v3281_v58 = vld [vmem:[%s4535_s17] sm:$0xff] }
 0x717   :  { %v830_v63 = vpop.f32.mrf.mxu0  ;;  %v3305_v59 = vld [vmem:[%s4535_s17 + $0xc0] sm:$0xff]  ;;  %1422 = vmatpush.bf16.msrb.mxu3 %v3281_v58 }
 0x718   :  { %v848_v2 = vpop.f32.mrf.mxu1  ;;  %v831_v13 = vadd.f32 %v830_v63, %v756_v48  ;;  %1476 = vmatpush.bf16.msrb.mxu2 %v3305_v59  ;;  %v2940_v59 = vld [vmem:[%s4534_s15 + $0x28] sm:$0xf] }
 0x719   :  { %v849_v23 = vadd.f32 %v848_v2, %v757_v5 }
 0x71a   :  { %v876_v35 = vmax.f32 %v831_v13, 0.0 }
 0x71b   :  { %v877_v38 = vmax.f32 %v849_v23, 0.0 }
 0x71d   :  { %v812_v10 = vpop.f32.mrf.mxu3 }
 0x71e   :  { %v866_v14 = vpop.f32.mrf.mxu2  ;;  %v813_v43 = vadd.f32 %v812_v10, %v755_v25 }
 0x71f   :  { %v832_v24 = vpop.f32.mrf.mxu0  ;;  %v867_v45 = vadd.f32 %v866_v14, %v758_v31 }
 0x720   :  { %v833_v26 = vadd.f32 %v832_v24, %v756_v48  ;;  %v850_v27 = vpop.f32.mrf.mxu1  ;;  %v875_v60 = vmax.f32 %v813_v43, 0.0 }
 0x721   :  { %v851_v34 = vadd.f32 %v850_v27, %v757_v5  ;;  %v878_v63 = vmax.f32 %v867_v45, 0.0  ;;  %v4103_v27 = vperm.slane %v533_v18, 1  ;;  %v2956_v45 = vld [vmem:[%s4534_s15 + $0xa8] sm:$0xf] }
 0x722   :  { %v880_v36 = vmax.f32 %v833_v26, 0.0 }
 0x723   :  { %v881_v39 = vmax.f32 %v851_v34, 0.0  ;;  %v619_v30 = vadd.f32 %v3961_v20, %v4103_v27  ;;  %v3359_v20 = vld [vmem:[%s4534_s15 + $0xdc] sm:$0xf0]  ;;  %v617_v43 = vadd.f32 %v3929_v7, %v4103_v27  ;;  %v3358_v7 = vld [vmem:[%s4534_s15 + $0xac] sm:$0xf] }
 0x724   :  { %v888_v44 = vpack.c.bf16 %v880_v36, %v876_v35  ;;  %v4107_v36 = vperm.slane %v533_v18, 0 }
 0x725   :  { %v889_v50 = vpack.c.bf16 %v881_v39, %v877_v38  ;;  %v814_v16 = vpop.f32.mrf.mxu3  ;;  %v2948_v39 = vld [vmem:[%s4534_s15 + $0xa0] sm:$0xf] }
 0x726   :  { %v815_v52 = vadd.f32 %v814_v16, %v755_v25  ;;  %v868_v53 = vpop.f32.mrf.mxu2  ;;  %1177 = vmatmul.bf16.vlgmr.msra.gmra.mxu0 %v888_v44  ;;  %v2949_v44 = vor.u32 %v3359_v20, %v2948_v39 }
 0x727   :  { %v869_v21 = vadd.f32 %v868_v53, %v758_v31  ;;  %1195 = vmatmul.bf16.vlgmr.msra.gmra.mxu1 %v889_v50  ;;  %v835_v57 = vpop.f32.mrf.mxu0  ;;  %v3360_v50 = vld [vmem:[%s4534_s15 + $0xe4] sm:$0xf0] }
 0x728   :  { %v879_v61 = vmax.f32 %v815_v52, 0.0  ;;  %v853_v62 = vpop.f32.mrf.mxu1  ;;  %v836_v3 = vadd.f32 %v835_v57, %v756_v48  ;;  %v2957_v53 = vor.u32 %v3360_v50, %v2956_v45  ;;  %v3353_v57 = vld [vmem:[%s4534_s15 + $0x24] sm:$0xf] }
 0x729   :  { %v882_v0 = vmax.f32 %v869_v21, 0.0  ;;  %v854_v4 = vadd.f32 %v853_v62, %v757_v5  ;;  %v2958_v21 = vld [vmem:[%s4534_s15 + $0xe8] sm:$0xf0] }
 0x72a   :  { %v887_v1 = vpack.c.bf16 %v879_v61, %v875_v60  ;;  %v884_v11 = vmax.f32 %v836_v3, 0.0  ;;  %v2961_v58 = vor.u32 %v3358_v7, %v2958_v21  ;;  %v3356_v60 = vld [vmem:[%s4534_s15 + $0x64] sm:$0xf0]  ;;  %1587 = vmatpush.bf16.msra.mxu1 %v2957_v53 }
 0x72b   :  { %v890_v2 = vpack.c.bf16 %v882_v0, %v878_v63  ;;  %v885_v13 = vmax.f32 %v854_v4, 0.0  ;;  %v2941_v63 = vor.u32 %v3356_v60, %v2940_v59  ;;  %v662_v0 = vmax.f32 %v617_v43, 0.0  ;;  %v3376_v43 = vld [vmem:[%s4535_s17 + $0x278] sm:$0xff] }
 0x72c   :  { %1159 = vmatmul.bf16.vlgmr.msra.gmra.mxu3 %v887_v1  ;;  %v892_v23 = vpack.c.bf16 %v884_v11, %v884_v11  ;;  %v601_v1 = vadd.f32 %v3983_v28, %v4107_v36  ;;  %v599_v4 = vadd.f32 %v3951_v15, %v4107_v36  ;;  %v2932_v28 = vld [vmem:[%s4534_s15 + $0x20] sm:$0xf]  ;;  %v3354_v15 = vld [vmem:[%s4534_s15 + $0x2c] sm:$0xf] }
 0x72d   :  { %1213 = vmatmul.bf16.vlgmr.msra.gmra.mxu2 %v890_v2  ;;  %v817_v6 = vpop.f32.mrf.mxu3  ;;  %v893_v26 = vpack.c.bf16 %v885_v13, %v885_v13  ;;  %1551 = vmatpush.bf16.msra.mxu3 %v2949_v44  ;;  %v655_v2 = vadd.f32 %v3985_v29, %v4109_v37  ;;  %v3355_v29 = vld [vmem:[%s4534_s15 + $0x5c] sm:$0xf0]  ;;  %v3384_v44 = vld [vmem:[%s4535_s17 + $0x2b8] sm:$0xff] }
 0x72e   :  { %v871_v9 = vpop.f32.mrf.mxu2  ;;  %v818_v14 = vadd.f32 %v817_v6, %v755_v25  ;;  %v537_v25 = vperm.slane %v533_v18, 2  ;;  %1605 = vmatpush.bf16.msra.mxu2 %v2961_v58  ;;  %1588 = vmatpush.bf16.msra.mxu1 %v2941_v63  ;;  %v665_v11 = vmax.f32 %v601_v1, 0.0  ;;  %v2933_v13 = vor.u32 %v3355_v29, %v2932_v28  ;;  %v3374_v58 = vld [vmem:[%s4535_s17 + $0x268] sm:$0xff]  ;;  %v3373_v63 = vld [vmem:[%s4535_s17 + $0x260] sm:$0xff]  ;;  %v3391_v28 = vld [vmem:[%s4535_s17 + $0x2f0] sm:$0xff] }
 0x72f   :  { %v837_v10 = vpop.f32.mrf.mxu0  ;;  %v872_v19 = vadd.f32 %v871_v9, %v758_v31  ;;  %v666_v31 = vmax.f32 %v619_v30, 0.0  ;;  %v653_v9 = vadd.f32 %v3953_v17, %v4109_v37  ;;  %v661_v17 = vmax.f32 %v599_v4, 0.0 }
 0x730   :  { %v855_v55 = vpop.f32.mrf.mxu1  ;;  %v883_v48 = vmax.f32 %v818_v14, 0.0  ;;  %v637_v38 = vadd.f32 %v3963_v22, %v537_v25  ;;  %v2950_v22 = vld [vmem:[%s4534_s15 + $0xe0] sm:$0xf0]  ;;  %v635_v16 = vadd.f32 %v3931_v8, %v537_v25  ;;  %v2942_v14 = vld [vmem:[%s4534_s15 + $0x68] sm:$0xf0]  ;;  %v604_v30 = vadd.f32 %v4015_v40, %v4107_v36 }
 0x731   :  { %v886_v12 = vmax.f32 %v872_v19, 0.0  ;;  %v2953_v52 = vor.u32 %v3357_v42, %v2950_v22  ;;  %v2934_v8 = vld [vmem:[%s4534_s15 + $0x60] sm:$0xf0]  ;;  %v674_v6 = vpack.c.bf16 %v666_v31, %v662_v0  ;;  %v668_v55 = vmax.f32 %v655_v2, 0.0  ;;  %1552 = vmatpush.bf16.msra.mxu3 %v2933_v13  ;;  %v3392_v2 = vld [vmem:[%s4535_s17 + $0x2f8] sm:$0xff]  ;;  %v3371_v13 = vld [vmem:[%s4535_s17 + $0x250] sm:$0xff] }
 0x732   :  { %v891_v34 = vpack.c.bf16 %v883_v48, %v883_v48  ;;  %v667_v61 = vmax.f32 %v637_v38, 0.0  ;;  %v2937_v62 = vor.u32 %v3353_v57, %v2934_v8  ;;  %v663_v3 = vmax.f32 %v635_v16, 0.0  ;;  %v3375_v16 = vld [vmem:[%s4535_s17 + $0x270] sm:$0xff]  ;;  %v3382_v8 = vld [vmem:[%s4535_s17 + $0x2a8] sm:$0xff]  ;;  %v3381_v0 = vld [vmem:[%s4535_s17 + $0x2a0] sm:$0xff] }
 0x733   :  { %v894_v35 = vpack.c.bf16 %v886_v12, %v886_v12  ;;  %1569 = vmatpush.bf16.msra.mxu0 %v2953_v52  ;;  %v664_v18 = vmax.f32 %v653_v9, 0.0  ;;  %v2945_v19 = vor.u32 %v3354_v15, %v2942_v14  ;;  %v640_v48 = vadd.f32 %v3995_v33, %v537_v25  ;;  %v3383_v52 = vld [vmem:[%s4535_s17 + $0x2b0] sm:$0xff] }
 0x734   :  { %v675_v10 = vpack.c.bf16 %v667_v61, %v663_v3  ;;  %v669_v38 = vmax.f32 %v604_v30, 0.0  ;;  %v3367_v9 = vld [vmem:[%s4535_s17 + $0x230] sm:$0xff] }
 0x735   :  { %v819_v24 = vpop.f32.mrf.mxu3  ;;  %1606 = vmatpush.bf16.msra.mxu2 %v2945_v19  ;;  %v671_v12 = vmax.f32 %v640_v48, 0.0  ;;  %v3379_v14 = vld [vmem:[%s4535_s17 + $0x290] sm:$0xff]  ;;  %v3390_v19 = vld [vmem:[%s4535_s17 + $0x2e8] sm:$0xff] }
 0x736   :  { %v873_v5 = vpop.f32.mrf.mxu2  ;;  %1182 = vmatmul.bf16.gmra.mxu0 %v892_v23  ;;  %v673_v23 = vpack.c.bf16 %v665_v11, %v661_v17  ;;  %v676_v24 = vpack.c.bf16 %v668_v55, %v664_v18  ;;  %v677_v20 = vpack.c.bf16 %v669_v38, %v669_v38  ;;  %v3380_v55 = vld [vmem:[%s4535_s17 + $0x298] sm:$0xff]  ;;  %v3366_v17 = vld [vmem:[%s4535_s17 + $0x228] sm:$0xff] }
 0x737   :  { %1200 = vmatmul.bf16.gmra.mxu1 %v893_v26  ;;  %1570 = vmatpush.bf16.msra.mxu0 %v2937_v62  ;;  %v622_v26 = vadd.f32 %v3993_v32, %v4103_v27  ;;  %v679_v31 = vpack.c.bf16 %v671_v12, %v671_v12  ;;  %v3368_v62 = vld [vmem:[%s4535_s17 + $0x238] sm:$0xff]  ;;  %v3378_v48 = vld [vmem:[%s4535_s17 + $0x288] sm:$0xff]  ;;  %v3389_v12 = vld [vmem:[%s4535_s17 + $0x2e0] sm:$0xff] }
 0x739   :  { %v670_v5 = vmax.f32 %v622_v26, 0.0  ;;  %v3370_v26 = vld [vmem:[%s4535_s17 + $0x248] sm:$0xff] }
 0x73c   :  { %1164 = vmatmul.bf16.gmra.mxu3 %v891_v34  ;;  %v658_v34 = vadd.f32 %v4017_v41, %v4109_v37 }
 0x73d   :  { %1218 = vmatmul.bf16.gmra.mxu2 %v894_v35  ;;  %v678_v35 = vpack.c.bf16 %v670_v5, %v670_v5 }
 0x73e   :  { %v672_v39 = vmax.f32 %v658_v34, 0.0  ;;  %v3364_v34 = vld [vmem:[%s4535_s17 + $0x218] sm:$0xff] }
 0x740   :  { %v680_v32 = vpack.c.bf16 %v672_v39, %v672_v39  ;;  %v3388_v39 = vld [vmem:[%s4535_s17 + $0x2d8] sm:$0xff] }
 0x746   :  { %1441 = vmatmul.bf16.vlgmr.msrb.gmra.mxu0 %v674_v6 }
 0x747   :  { %1459 = vmatmul.bf16.vlgmr.msrb.gmra.mxu1 %v675_v10  ;;  %1911 = vmatpush.bf16.msrb.mxu0 %v3376_v43  ;;  %v3372_v10 = vld [vmem:[%s4535_s17 + $0x258] sm:$0xff]  ;;  %v3386_v43 = vld [vmem:[%s4535_s17 + $0x2c8] sm:$0xff] }
 0x748   :  { %1929 = vmatpush.bf16.msrb.mxu1 %v3384_v44 }
 0x74b   :  { %1912 = vmatpush.bf16.msrb.mxu0 %v3375_v16  ;;  %v3361_v16 = vld [vmem:[%s4535_s17 + $0x200] sm:$0xff] }
 0x74c   :  { %1423 = vmatmul.bf16.vlgmr.msrb.gmra.mxu3 %v673_v23  ;;  %1930 = vmatpush.bf16.msrb.mxu1 %v3383_v52  ;;  %v3385_v52 = vld [vmem:[%s4535_s17 + $0x2c0] sm:$0xff] }
 0x74d   :  { %1477 = vmatmul.bf16.vlgmr.msrb.gmra.mxu2 %v676_v24  ;;  %1893 = vmatpush.bf16.msrb.mxu3 %v3368_v62  ;;  %v3365_v24 = vld [vmem:[%s4535_s17 + $0x220] sm:$0xff] }
 0x74e   :  { %1947 = vmatpush.bf16.msrb.mxu2 %v3392_v2 }
 0x74f   :  { %1913 = vmatpush.bf16.msrb.mxu0 %v3374_v58 }
 0x750   :  { %1931 = vmatpush.bf16.msrb.mxu1 %v3382_v8 }
 0x751   :  { %1894 = vmatpush.bf16.msrb.mxu3 %v3367_v9  ;;  %v3397_v9 = vld [vmem:[%s4534_s15 + $0xb4] sm:$0xf] }
 0x752   :  { %1948 = vmatpush.bf16.msrb.mxu2 %v3391_v28  ;;  %v3400_v28 = vld [vmem:[%s4534_s15 + $0xf4] sm:$0xf0] }
 0x753   :  { %1914 = vmatpush.bf16.msrb.mxu0 %v3373_v63 }
 0x754   :  { %1932 = vmatpush.bf16.msrb.mxu1 %v3381_v0 }
 0x755   :  { %1895 = vmatpush.bf16.msrb.mxu3 %v3366_v17 }
 0x756   :  { %1446 = vmatmul.bf16.gmra.mxu0 %v678_v35  ;;  %1949 = vmatpush.bf16.msrb.mxu2 %v3390_v19  ;;  %v3369_v35 = vld [vmem:[%s4535_s17 + $0x240] sm:$0xff] }
 0x757   :  { %1464 = vmatmul.bf16.gmra.mxu1 %v679_v31  ;;  %1915 = vmatpush.bf16.msrb.mxu0 %v3372_v10  ;;  %v3377_v31 = vld [vmem:[%s4535_s17 + $0x280] sm:$0xff]  ;;  %v3118_v10 = vld [vmem:[%s4534_s15 + $0xf0] sm:$0xf0] }
 0x758   :  { %1933 = vmatpush.bf16.msrb.mxu1 %v3380_v55  ;;  %v3121_v55 = vor.u32 %v3397_v9, %v3118_v10 }
 0x759   :  { %1896 = vmatpush.bf16.msrb.mxu3 %v3365_v24  ;;  %v3102_v24 = vld [vmem:[%s4534_s15 + $0x70] sm:$0xf0] }
 0x75a   :  { %1950 = vmatpush.bf16.msrb.mxu2 %v3389_v12 }
 0x75b   :  { %1916 = vmatpush.bf16.msrb.mxu0 %v3371_v13 }
 0x75c   :  { %1428 = vmatmul.bf16.gmra.mxu3 %v677_v20  ;;  %1934 = vmatpush.bf16.msrb.mxu1 %v3379_v14 }
 0x75d   :  { %1482 = vmatmul.bf16.gmra.mxu2 %v680_v32  ;;  %1897 = vmatpush.bf16.msrb.mxu3 %v3364_v34 }
 0x75e   :  { %1951 = vmatpush.bf16.msrb.mxu2 %v3388_v39  ;;  %v3399_v39 = vld [vmem:[%s4534_s15 + $0xec] sm:$0xf0] }
 0x75f   :  { %1917 = vmatpush.bf16.msrb.mxu0 %v3370_v26  ;;  %v3108_v26 = vld [vmem:[%s4534_s15 + $0x38] sm:$0xf] }
 0x760   :  { %1935 = vmatpush.bf16.msrb.mxu1 %v3378_v48 }
 0x763   :  { %1918 = vmatpush.bf16.msrb.mxu0 %v3369_v35 }
 0x764   :  { %1936 = vmatpush.bf16.msrb.mxu1 %v3377_v31 }
 0x766   :  { %2964 = vmatmul.msk.bf16.vlgmr.msra.gmra.mxu0 %vm175_vm3, %v3840_v51 }
 0x767   :  { %2966 = vmatmul.msk.bf16.vlgmr.msra.gmra.mxu1 %vm175_vm3, %v3840_v51  ;;  %2050 = vmatpush.bf16.msra.mxu0 %v3121_v55 }
 0x76c   :  { %2962 = vmatmul.msk.bf16.vlgmr.msra.gmra.mxu3 %vm175_vm3, %v3840_v51 }
 0x76d   :  { %2968 = vmatmul.msk.bf16.vlgmr.msra.gmra.mxu2 %vm175_vm3, %v3840_v51 }
 0x776   :  { %2965 = vmatmul.msk.bf16.gmra.mxu0 %vm175_vm3, %v3855_v56 }
 0x777   :  { %2967 = vmatmul.msk.bf16.gmra.mxu1 %vm175_vm3, %v3855_v56 }
 0x77c   :  { %2963 = vmatmul.msk.bf16.gmra.mxu3 %vm175_vm3, %v3855_v56 }
 0x77d   :  { %2969 = vmatmul.msk.bf16.gmra.mxu2 %vm175_vm3, %v3855_v56 }
 0x7a3   :  { %v1178_v33 = vpop.f32.mrf.mxu0 }
 0x7a4   :  { %v1196_v40 = vpop.f32.mrf.mxu1 }
 0x7ab   :  { %v1180_v41 = vpop.f32.mrf.mxu0 }
 0x7ac   :  { %v1198_v27 = vpop.f32.mrf.mxu1 }
 0x7af   :  { %v1160_v25 = vpop.f32.mrf.mxu3 }
 0x7b0   :  { %v1179_v36 = vadd.f32 %v1178_v33, %v1160_v25  ;;  %v1214_v37 = vpop.f32.mrf.mxu2 }
 0x7b2   :  { %v1197_v42 = vadd.f32 %v1196_v40, %v1179_v36  ;;  %v3363_v40 = vld [vmem:[%s4535_s17 + $0x210] sm:$0xff] }
 0x7b3   :  { %v1183_v22 = vpop.f32.mrf.mxu0  ;;  %1898 = vmatpush.bf16.msrb.mxu3 %v3363_v40 }
 0x7b4   :  { %v4200_v45 = vadd.f32 %v1214_v37, %v1197_v42  ;;  %v1201_v50 = vpop.f32.mrf.mxu1  ;;  %v3362_v42 = vld [vmem:[%s4535_s17 + $0x208] sm:$0xff] }
 0x7b7   :  { %v1162_v53 = vpop.f32.mrf.mxu3  ;;  %1899 = vmatpush.bf16.msrb.mxu3 %v3362_v42  ;;  %v3398_v42 = vld [vmem:[%s4534_s15 + $0xbc] sm:$0xf] }
 0x7b8   :  { %v1181_v7 = vadd.f32 %v1180_v41, %v1162_v53  ;;  %v1216_v21 = vpop.f32.mrf.mxu2  ;;  %v3387_v41 = vld [vmem:[%s4535_s17 + $0x2d0] sm:$0xff] }
 0x7b9   :  { %1952 = vmatpush.bf16.msrb.mxu2 %v3387_v41 }
 0x7ba   :  { %v1199_v57 = vadd.f32 %v1198_v27, %v1181_v7 }
 0x7bb   :  { %v1185_v59 = vpop.f32.mrf.mxu0  ;;  %1900 = vmatpush.bf16.msrb.mxu3 %v3361_v16  ;;  %v3394_v16 = vld [vmem:[%s4534_s15 + $0x3c] sm:$0xf] }
 0x7bc   :  { %v4214_v60 = vadd.f32 %v1216_v21, %v1199_v57  ;;  %v1203_v61 = vpop.f32.mrf.mxu1 }
 0x7bd   :  { %1953 = vmatpush.bf16.msrb.mxu2 %v3386_v43  ;;  %v1495_v61 = vld [vmem:[%s4536_s16 + $0x8] sm:$0xf]  ;;  %v3126_v43 = vld [vmem:[%s4534_s15 + $0xf8] sm:$0xf0] }
 0x7be   :  { %v1498_v2 = vperm.slane %v1495_v61, 1 }
 0x7bf   :  { %v1165_v1 = vpop.f32.mrf.mxu3 }
 0x7c0   :  { %v1184_v3 = vadd.f32 %v1183_v22, %v1165_v1  ;;  %v1219_v4 = vpop.f32.mrf.mxu2 }
 0x7c1   :  { %1954 = vmatpush.bf16.msrb.mxu2 %v3385_v52 }
 0x7c2   :  { %v1202_v6 = vadd.f32 %v1201_v50, %v1184_v3  ;;  %v1499_v3 = vperm.slane %v1495_v61, 2 }
 0x7c3   :  { %v1442_v11 = vpop.f32.mrf.mxu0 }
 0x7c4   :  { %v4240_v29 = vadd.f32 %v1219_v4, %v1202_v6  ;;  %v1460_v15 = vpop.f32.mrf.mxu1 }
 0x7c7   :  { %v1167_v18 = vpop.f32.mrf.mxu3 }
 0x7c8   :  { %v1221_v23 = vpop.f32.mrf.mxu2 }
 0x7c9   :  { %v3393_v23 = vld [vmem:[%s4534_s15 + $0x34] sm:$0xf] }
 0x7ca   :  { %v3105_v12 = vor.u32 %v3393_v23, %v3102_v24 }
 0x7cb   :  { %v1444_v5 = vpop.f32.mrf.mxu0 }
 0x7cc   :  { %v1462_v30 = vpop.f32.mrf.mxu1  ;;  %2051 = vmatpush.bf16.msra.mxu0 %v3105_v12  ;;  %v3416_v12 = vld [vmem:[%s4535_s17 + $0x378] sm:$0xff] }
 0x7cf   :  { %v1424_v38 = vpop.f32.mrf.mxu3 }
 0x7d0   :  { %v1425_v20 = vadd.f32 %v1424_v38, %v4200_v45  ;;  %v1478_v32 = vpop.f32.mrf.mxu2  ;;  %v3116_v38 = vld [vmem:[%s4534_s15 + $0xb0] sm:$0xf] }
 0x7d1   :  { %v3117_v40 = vor.u32 %v3399_v39, %v3116_v38  ;;  %v3421_v38 = vld [vmem:[%s4535_s17 + $0x3a0] sm:$0xff]  ;;  %v3412_v39 = vld [vmem:[%s4535_s17 + $0x358] sm:$0xff] }
 0x7d2   :  { %v1443_v33 = vadd.f32 %v1442_v11, %v1425_v20  ;;  %v3124_v11 = vld [vmem:[%s4534_s15 + $0xb8] sm:$0xf] }
 0x7d3   :  { %v1447_v27 = vpop.f32.mrf.mxu0  ;;  %2032 = vmatpush.bf16.msra.mxu3 %v3117_v40  ;;  %v3408_v40 = vld [vmem:[%s4535_s17 + $0x338] sm:$0xff] }
 0x7d4   :  { %v1461_v25 = vadd.f32 %v1460_v15, %v1443_v33  ;;  %v1465_v36 = vpop.f32.mrf.mxu1  ;;  %v3125_v15 = vor.u32 %v3400_v28, %v3124_v11 }
 0x7d6   :  { %v4285_v37 = vadd.f32 %v1478_v32, %v1461_v25  ;;  %2068 = vmatpush.bf16.msra.mxu1 %v3125_v15  ;;  %v1500_v25 = vperm.slane %v1495_v61, 3 }
 0x7d7   :  { %v1426_v44 = vpop.f32.mrf.mxu3 }
 0x7d8   :  { %v1427_v22 = vadd.f32 %v1426_v44, %v4214_v60  ;;  %v1480_v45 = vpop.f32.mrf.mxu2 }
 0x7da   :  { %v1445_v50 = vadd.f32 %v1444_v5, %v1427_v22  ;;  %v3129_v22 = vor.u32 %v3398_v42, %v3126_v43  ;;  %v3431_v42 = vld [vmem:[%s4535_s17 + $0x3f0] sm:$0xff]  ;;  %v3410_v43 = vld [vmem:[%s4535_s17 + $0x348] sm:$0xff] }
 0x7db   :  { %v1449_v53 = vpop.f32.mrf.mxu0 }
 0x7dc   :  { %v1463_v7 = vadd.f32 %v1462_v30, %v1445_v50  ;;  %v1467_v21 = vpop.f32.mrf.mxu1  ;;  %v3396_v30 = vld [vmem:[%s4534_s15 + $0x74] sm:$0xf0]  ;;  %v3395_v50 = vld [vmem:[%s4534_s15 + $0x6c] sm:$0xf0]  ;;  %v3110_v53 = vld [vmem:[%s4534_s15 + $0x78] sm:$0xf0]  ;;  %2086 = vmatpush.bf16.msra.mxu2 %v3129_v22 }
 0x7dd   :  { %v3109_v20 = vor.u32 %v3396_v30, %v3108_v26  ;;  %v3113_v21 = vor.u32 %v3394_v16, %v3110_v53  ;;  %v3415_v30 = vld [vmem:[%s4535_s17 + $0x370] sm:$0xff]  ;;  %v3430_v16 = vld [vmem:[%s4535_s17 + $0x3e8] sm:$0xff]  ;;  %v3417_v53 = vld [vmem:[%s4535_s17 + $0x380] sm:$0xff] }
 0x7de   :  { %v4300_v57 = vadd.f32 %v1480_v45, %v1463_v7  ;;  %v3100_v45 = vld [vmem:[%s4534_s15 + $0x30] sm:$0xf] }
 0x7df   :  { %v1429_v58 = vpop.f32.mrf.mxu3  ;;  %2069 = vmatpush.bf16.msra.mxu1 %v3109_v20  ;;  %v3101_v52 = vor.u32 %v3395_v50, %v3100_v45  ;;  %v3420_v20 = vld [vmem:[%s4535_s17 + $0x398] sm:$0xff]  ;;  %v3406_v50 = vld [vmem:[%s4535_s17 + $0x328] sm:$0xff] }
 0x7e0   :  { %v1430_v8 = vadd.f32 %v1429_v58, %v4240_v29  ;;  %v1483_v59 = vpop.f32.mrf.mxu2  ;;  %2087 = vmatpush.bf16.msra.mxu2 %v3113_v21  ;;  %v3429_v21 = vld [vmem:[%s4535_s17 + $0x3e0] sm:$0xff] }
 0x7e1   :  { %2033 = vmatpush.bf16.msra.mxu3 %v3101_v52  ;;  %v3409_v52 = vld [vmem:[%s4535_s17 + $0x340] sm:$0xff] }
 0x7e2   :  { %v1448_v60 = vadd.f32 %v1447_v27, %v1430_v8  ;;  %v1497_v27 = vperm.slane %v1495_v61, 0 }
 0x7e3   :  { %v1572_v62 = vpop.f32.mrf.mxu0 }
 0x7e4   :  { %v1466_v63 = vadd.f32 %v1465_v36, %v1448_v60  ;;  %v1590_v0 = vpop.f32.mrf.mxu1  ;;  %v1573_v29 = vadd.f32 %v1572_v62, %v1498_v2 }
 0x7e5   :  { %v1591_v17 = vadd.f32 %v1590_v0, %v1499_v3 }
 0x7e6   :  { %v4306_v1 = vadd.f32 %v1483_v59, %v1466_v63  ;;  %v1618_v48 = vmax.f32 %v1573_v29, 0.0 }
 0x7e7   :  { %v1431_v4 = vpop.f32.mrf.mxu3  ;;  %v1619_v34 = vmax.f32 %v1591_v17, 0.0 }
 0x7e8   :  { %v1485_v6 = vpop.f32.mrf.mxu2 }
 0x7eb   :  { %v1574_v13 = vpop.f32.mrf.mxu0 }
 0x7ec   :  { %v1575_v14 = vadd.f32 %v1574_v13, %v1498_v2  ;;  %v1592_v18 = vpop.f32.mrf.mxu1 }
 0x7ed   :  { %v1593_v19 = vadd.f32 %v1592_v18, %v1499_v3 }
 0x7ee   :  { %v1622_v5 = vmax.f32 %v1575_v14, 0.0 }
 0x7ef   :  { %v1623_v35 = vmax.f32 %v1593_v19, 0.0  ;;  %v1554_v31 = vpop.f32.mrf.mxu3 }
 0x7f0   :  { %v1630_v32 = vpack.c.bf16 %v1622_v5, %v1618_v48  ;;  %v1608_v33 = vpop.f32.mrf.mxu2  ;;  %v1555_v7 = vadd.f32 %v1554_v31, %v1497_v27  ;;  %v3413_v31 = vld [vmem:[%s4535_s17 + $0x360] sm:$0xff] }
 0x7f1   :  { %v1631_v41 = vpack.c.bf16 %v1623_v35, %v1619_v34  ;;  %v1609_v58 = vadd.f32 %v1608_v33, %v1500_v25  ;;  %v3423_v34 = vld [vmem:[%s4535_s17 + $0x3b0] sm:$0xff]  ;;  %v3422_v35 = vld [vmem:[%s4535_s17 + $0x3a8] sm:$0xff] }
 0x7f2   :  { %1919 = vmatmul.bf16.vlgmr.msrb.gmra.mxu0 %v1630_v32  ;;  %v1617_v0 = vmax.f32 %v1555_v7, 0.0  ;;  %v3405_v7 = vld [vmem:[%s4535_s17 + $0x320] sm:$0xff] }
 0x7f3   :  { %1937 = vmatmul.bf16.vlgmr.msrb.gmra.mxu1 %v1631_v41  ;;  %v1577_v36 = vpop.f32.mrf.mxu0  ;;  %v1620_v6 = vmax.f32 %v1609_v58, 0.0  ;;  %2392 = vmatpush.bf16.msrb.mxu0 %v3416_v12  ;;  %v3432_v41 = vld [vmem:[%s4535_s17 + $0x3f8] sm:$0xff] }
 0x7f4   :  { %v1595_v44 = vpop.f32.mrf.mxu1  ;;  %v1578_v59 = vadd.f32 %v1577_v36, %v1498_v2  ;;  %v3407_v36 = vld [vmem:[%s4535_s17 + $0x330] sm:$0xff] }
 0x7f5   :  { %v1596_v62 = vadd.f32 %v1595_v44, %v1499_v3  ;;  %v3418_v44 = vld [vmem:[%s4535_s17 + $0x388] sm:$0xff] }
 0x7f6   :  { %v1626_v11 = vmax.f32 %v1578_v59, 0.0  ;;  %v3404_v59 = vld [vmem:[%s4535_s17 + $0x318] sm:$0xff] }
 0x7f7   :  { %v1556_v8 = vpop.f32.mrf.mxu3  ;;  %v1627_v29 = vmax.f32 %v1596_v62, 0.0  ;;  %2393 = vmatpush.bf16.msrb.mxu0 %v3415_v30 }
 0x7f8   :  { %v1557_v60 = vadd.f32 %v1556_v8, %v1497_v27  ;;  %v1610_v61 = vpop.f32.mrf.mxu2  ;;  %v1634_v13 = vpack.c.bf16 %v1626_v11, %v1626_v11 }
 0x7f9   :  { %v1611_v63 = vadd.f32 %v1610_v61, %v1500_v25  ;;  %v1635_v14 = vpack.c.bf16 %v1627_v29, %v1627_v29  ;;  %v3426_v29 = vld [vmem:[%s4535_s17 + $0x3c8] sm:$0xff] }
 0x7fa   :  { %v1621_v4 = vmax.f32 %v1557_v60, 0.0  ;;  %v3428_v60 = vld [vmem:[%s4535_s17 + $0x3d8] sm:$0xff] }
 0x7fb   :  { %v1624_v9 = vmax.f32 %v1611_v63, 0.0  ;;  %v1579_v10 = vpop.f32.mrf.mxu0 }
 0x7fc   :  { %v1629_v55 = vpack.c.bf16 %v1621_v4, %v1617_v0  ;;  %v1597_v28 = vpop.f32.mrf.mxu1  ;;  %v3403_v4 = vld [vmem:[%s4535_s17 + $0x310] sm:$0xff] }
 0x7fd   :  { %v1632_v15 = vpack.c.bf16 %v1624_v9, %v1620_v6  ;;  %v3427_v6 = vld [vmem:[%s4535_s17 + $0x3d0] sm:$0xff]  ;;  %v3402_v28 = vld [vmem:[%s4535_s17 + $0x308] sm:$0xff] }
 0x7fe   :  { %1901 = vmatmul.bf16.vlgmr.msrb.gmra.mxu3 %v1629_v55 }
 0x7ff   :  { %1955 = vmatmul.bf16.vlgmr.msrb.gmra.mxu2 %v1632_v15  ;;  %v1559_v17 = vpop.f32.mrf.mxu3  ;;  %2374 = vmatpush.bf16.msrb.mxu3 %v3408_v40 }
 0x800   :  { %v1613_v2 = vpop.f32.mrf.mxu2  ;;  %v1560_v3 = vadd.f32 %v1559_v17, %v1497_v27  ;;  %2428 = vmatpush.bf16.msrb.mxu2 %v3432_v41  ;;  %v3411_v27 = vld [vmem:[%s4535_s17 + $0x350] sm:$0xff] }
 0x801   :  { %v1614_v18 = vadd.f32 %v1613_v2, %v1500_v25  ;;  %v3419_v25 = vld [vmem:[%s4535_s17 + $0x390] sm:$0xff] }
 0x802   :  { %1924 = vmatmul.bf16.gmra.mxu0 %v1634_v13  ;;  %v1625_v23 = vmax.f32 %v1560_v3, 0.0 }
 0x803   :  { %1942 = vmatmul.bf16.gmra.mxu1 %v1635_v14  ;;  %v1628_v26 = vmax.f32 %v1614_v18, 0.0  ;;  %2375 = vmatpush.bf16.msrb.mxu3 %v3407_v36  ;;  %v3425_v14 = vld [vmem:[%s4535_s17 + $0x3c0] sm:$0xff]  ;;  %v1976_v18 = vld [vmem:[%s4536_s16 + $0xc] sm:$0xf] }
 0x804   :  { %v1633_v48 = vpack.c.bf16 %v1625_v23, %v1625_v23  ;;  %2429 = vmatpush.bf16.msrb.mxu2 %v3431_v42 }
 0x805   :  { %v1636_v5 = vpack.c.bf16 %v1628_v26, %v1628_v26 }
 0x807   :  { %v1561_v19 = vpop.f32.mrf.mxu3  ;;  %2376 = vmatpush.bf16.msrb.mxu3 %v3406_v50 }
 0x808   :  { %v1615_v24 = vpop.f32.mrf.mxu2  ;;  %2430 = vmatpush.bf16.msrb.mxu2 %v3430_v16 }
 0x80b   :  { %2377 = vmatpush.bf16.msrb.mxu3 %v3405_v7 }
 0x80c   :  { %2431 = vmatpush.bf16.msrb.mxu2 %v3429_v21 }
 0x80e   :  { %1906 = vmatmul.bf16.gmra.mxu3 %v1633_v48  ;;  %v1979_v48 = vperm.slane %v1976_v18, 1 }
 0x80f   :  { %1960 = vmatmul.bf16.gmra.mxu2 %v1636_v5  ;;  %2378 = vmatpush.bf16.msrb.mxu3 %v3404_v59 }
 0x810   :  { %2432 = vmatpush.bf16.msrb.mxu2 %v3428_v60 }
 0x812   :  { %3132 = vmatmul.msk.bf16.vlgmr.msra.gmra.mxu0 %vm175_vm3, %v3840_v51 }
 0x813   :  { %3134 = vmatmul.msk.bf16.vlgmr.msra.gmra.mxu1 %vm175_vm3, %v3840_v51  ;;  %2379 = vmatpush.bf16.msrb.mxu3 %v3403_v4 }
 0x814   :  { %2433 = vmatpush.bf16.msrb.mxu2 %v3427_v6 }
 0x817   :  { %2380 = vmatpush.bf16.msrb.mxu3 %v3402_v28 }
 0x818   :  { %2434 = vmatpush.bf16.msrb.mxu2 %v3426_v29 }
 0x81c   :  { %2435 = vmatpush.bf16.msrb.mxu2 %v3425_v14 }
 0x81e   :  { %3130 = vmatmul.msk.bf16.vlgmr.msra.gmra.mxu3 %vm175_vm3, %v3840_v51 }
 0x81f   :  { %3136 = vmatmul.msk.bf16.vlgmr.msra.gmra.mxu2 %vm175_vm3, %v3840_v51  ;;  %v3424_v51 = vld [vmem:[%s4535_s17 + $0x3b8] sm:$0xff] }
 0x820   :  { %2410 = vmatpush.bf16.msrb.mxu1 %v3424_v51  ;;  %v1980_v51 = vperm.slane %v1976_v18, 2 }
 0x822   :  { %3133 = vmatmul.msk.bf16.gmra.mxu0 %vm175_vm3, %v3855_v56 }
 0x823   :  { %3135 = vmatmul.msk.bf16.gmra.mxu1 %vm175_vm3, %v3855_v56 }
 0x824   :  { %2411 = vmatpush.bf16.msrb.mxu1 %v3423_v34 }
 0x828   :  { %2412 = vmatpush.bf16.msrb.mxu1 %v3422_v35 }
 0x82c   :  { %2413 = vmatpush.bf16.msrb.mxu1 %v3421_v38 }
 0x82e   :  { %3131 = vmatmul.msk.bf16.gmra.mxu3 %vm175_vm3, %v3855_v56 }
 0x82f   :  { %3137 = vmatmul.msk.bf16.gmra.mxu2 %vm175_vm3, %v3855_v56  ;;  %v3414_v56 = vld [vmem:[%s4535_s17 + $0x368] sm:$0xff] }
 0x830   :  { %2394 = vmatpush.bf16.msrb.mxu0 %v3414_v56  ;;  %2414 = vmatpush.bf16.msrb.mxu1 %v3420_v20 }
 0x834   :  { %2395 = vmatpush.bf16.msrb.mxu0 %v3413_v31  ;;  %2415 = vmatpush.bf16.msrb.mxu1 %v3419_v25 }
 0x838   :  { %2396 = vmatpush.bf16.msrb.mxu0 %v3412_v39  ;;  %2416 = vmatpush.bf16.msrb.mxu1 %v3418_v44 }
 0x83c   :  { %2397 = vmatpush.bf16.msrb.mxu0 %v3411_v27  ;;  %2417 = vmatpush.bf16.msrb.mxu1 %v3417_v53 }
 0x840   :  { %2398 = vmatpush.bf16.msrb.mxu0 %v3410_v43 }
 0x844   :  { %2399 = vmatpush.bf16.msrb.mxu0 %v3409_v52  ;;  %v1981_v52 = vperm.slane %v1976_v18, 3 }
 0x86f   :  { %v1920_v32 = vpop.f32.mrf.mxu0 }
 0x870   :  { %v1938_v33 = vpop.f32.mrf.mxu1 }
 0x877   :  { %v1922_v22 = vpop.f32.mrf.mxu0 }
 0x878   :  { %v1940_v45 = vpop.f32.mrf.mxu1 }
 0x87f   :  { %v1925_v58 = vpop.f32.mrf.mxu0 }
 0x880   :  { %v1943_v8 = vpop.f32.mrf.mxu1 }
 0x881   :  { %v1902_v61 = vpop.f32.mrf.mxu3 }
 0x882   :  { %v1921_v62 = vadd.f32 %v1920_v32, %v1902_v61  ;;  %v1956_v63 = vpop.f32.mrf.mxu2 }
 0x884   :  { %v1939_v0 = vadd.f32 %v1938_v33, %v1921_v62 }
 0x886   :  { %v1957_v9 = vadd.f32 %v1956_v63, %v1939_v0 }
 0x887   :  { %v1927_v10 = vpop.f32.mrf.mxu0 }
 0x888   :  { %v4457_v11 = vadd.f32 %v1957_v9, %v4285_v37  ;;  %v1945_v55 = vpop.f32.mrf.mxu1  ;;  %v3401_v37 = vld [vmem:[%s4535_s17 + $0x300] sm:$0xff] }
 0x889   :  { %v1904_v15 = vpop.f32.mrf.mxu3  ;;  %2381 = vmatpush.bf16.msrb.mxu3 %v3401_v37 }
 0x88a   :  { %v1923_v17 = vadd.f32 %v1922_v22, %v1904_v15  ;;  %v1958_v13 = vpop.f32.mrf.mxu2 }
 0x88c   :  { %v1941_v2 = vadd.f32 %v1940_v45, %v1923_v17 }
 0x88e   :  { %v1959_v3 = vadd.f32 %v1958_v13, %v1941_v2 }
 0x88f   :  { %v2053_v19 = vpop.f32.mrf.mxu0 }
 0x890   :  { %v4475_v23 = vadd.f32 %v1959_v3, %v4300_v57  ;;  %v2071_v24 = vpop.f32.mrf.mxu1  ;;  %v2054_v34 = vadd.f32 %v2053_v19, %v1979_v48 }
 0x891   :  { %v1907_v26 = vpop.f32.mrf.mxu3  ;;  %v2072_v35 = vadd.f32 %v2071_v24, %v1980_v51 }
 0x892   :  { %v1926_v5 = vadd.f32 %v1925_v58, %v1907_v26  ;;  %v1961_v12 = vpop.f32.mrf.mxu2  ;;  %v2099_v57 = vmax.f32 %v2054_v34, 0.0 }
 0x893   :  { %v2100_v27 = vmax.f32 %v2072_v35, 0.0 }
 0x894   :  { %v1944_v30 = vadd.f32 %v1943_v8, %v1926_v5 }
 0x896   :  { %v1962_v56 = vadd.f32 %v1961_v12, %v1944_v30 }
 0x897   :  { %v2055_v31 = vpop.f32.mrf.mxu0 }
 0x898   :  { %v4478_v38 = vadd.f32 %v1962_v56, %v4306_v1  ;;  %v2056_v39 = vadd.f32 %v2055_v31, %v1979_v48  ;;  %v2073_v20 = vpop.f32.mrf.mxu1  ;;  %v1978_v1 = vperm.slane %v1976_v18, 0 }
 0x899   :  { %v2074_v32 = vadd.f32 %v2073_v20, %v1980_v51  ;;  %v1909_v33 = vpop.f32.mrf.mxu3 }
 0x89a   :  { %v2103_v40 = vmax.f32 %v2056_v39, 0.0  ;;  %v1963_v41 = vpop.f32.mrf.mxu2 }
 0x89b   :  { %v2104_v25 = vmax.f32 %v2074_v32, 0.0 }
 0x89c   :  { %v2111_v36 = vpack.c.bf16 %v2103_v40, %v2099_v57  ;;  %v3450_v57 = vld [vmem:[%s4537_s18] ss:$0 sm:$0xff] }
 0x89d   :  { %v2112_v42 = vpack.c.bf16 %v2104_v25, %v2100_v27 }
 0x89e   :  { %2400 = vmatmul.bf16.vlgmr.msrb.gmra.mxu0 %v2111_v36 }
 0x89f   :  { %2418 = vmatmul.bf16.vlgmr.msrb.gmra.mxu1 %v2112_v42  ;;  %v2058_v43 = vpop.f32.mrf.mxu0 }
 0x8a0   :  { %v2076_v44 = vpop.f32.mrf.mxu1  ;;  %v2059_v50 = vadd.f32 %v2058_v43, %v1979_v48 }
 0x8a1   :  { %v2035_v22 = vpop.f32.mrf.mxu3  ;;  %v2077_v16 = vadd.f32 %v2076_v44, %v1980_v51 }
 0x8a2   :  { %v2089_v45 = vpop.f32.mrf.mxu2  ;;  %v2107_v7 = vmax.f32 %v2059_v50, 0.0  ;;  %v2036_v21 = vadd.f32 %v2035_v22, %v1978_v1 }
 0x8a3   :  { %v2108_v8 = vmax.f32 %v2077_v16, 0.0  ;;  %v2090_v59 = vadd.f32 %v2089_v45, %v1981_v52 }
 0x8a4   :  { %v2115_v0 = vpack.c.bf16 %v2107_v7, %v2107_v7  ;;  %v2098_v4 = vmax.f32 %v2036_v21, 0.0 }
 0x8a5   :  { %v2116_v9 = vpack.c.bf16 %v2108_v8, %v2108_v8  ;;  %v2101_v10 = vmax.f32 %v2090_v59, 0.0 }
 0x8a7   :  { %v2060_v53 = vpop.f32.mrf.mxu0 }
 0x8a8   :  { %v2078_v58 = vpop.f32.mrf.mxu1 }
 0x8a9   :  { %v2037_v60 = vpop.f32.mrf.mxu3 }
 0x8aa   :  { %v2038_v61 = vadd.f32 %v2037_v60, %v1978_v1  ;;  %v2091_v62 = vpop.f32.mrf.mxu2 }
 0x8ab   :  { %v2092_v63 = vadd.f32 %v2091_v62, %v1981_v52 }
 0x8ac   :  { %v2102_v6 = vmax.f32 %v2038_v61, 0.0 }
 0x8ad   :  { %v2105_v55 = vmax.f32 %v2092_v63, 0.0 }
 0x8ae   :  { %v2110_v28 = vpack.c.bf16 %v2102_v6, %v2098_v4  ;;  %2405 = vmatmul.bf16.gmra.mxu0 %v2115_v0 }
 0x8af   :  { %v2113_v29 = vpack.c.bf16 %v2105_v55, %v2101_v10  ;;  %2423 = vmatmul.bf16.gmra.mxu1 %v2116_v9 }
 0x8b0   :  { %2382 = vmatmul.bf16.vlgmr.msrb.gmra.mxu3 %v2110_v28 }
 0x8b1   :  { %2436 = vmatmul.bf16.vlgmr.msrb.gmra.mxu2 %v2113_v29  ;;  %v2040_v15 = vpop.f32.mrf.mxu3 }
 0x8b2   :  { %v2094_v17 = vpop.f32.mrf.mxu2  ;;  %v2041_v13 = vadd.f32 %v2040_v15, %v1978_v1 }
 0x8b3   :  { %v2095_v2 = vadd.f32 %v2094_v17, %v1981_v52 }
 0x8b4   :  { %v2106_v14 = vmax.f32 %v2041_v13, 0.0 }
 0x8b5   :  { %v2109_v18 = vmax.f32 %v2095_v2, 0.0 }
 0x8b6   :  { %v2114_v19 = vpack.c.bf16 %v2106_v14, %v2106_v14 }
 0x8b7   :  { %v2117_v24 = vpack.c.bf16 %v2109_v18, %v2109_v18 }
 0x8b9   :  { %v2042_v37 = vpop.f32.mrf.mxu3 }
 0x8ba   :  { %v2096_v3 = vpop.f32.mrf.mxu2 }
 0x8c0   :  { %2387 = vmatmul.bf16.gmra.mxu3 %v2114_v19 }
 0x8c1   :  { %2441 = vmatmul.bf16.gmra.mxu2 %v2117_v24 }
 0x91b   :  { %v2401_v26 = vpop.f32.mrf.mxu0 }
 0x91c   :  { %v2419_v48 = vpop.f32.mrf.mxu1 }
 0x923   :  { %v2403_v5 = vpop.f32.mrf.mxu0 }
 0x924   :  { %v2421_v12 = vpop.f32.mrf.mxu1 }
 0x92b   :  { %v2406_v51 = vpop.f32.mrf.mxu0 }
 0x92c   :  { %v2424_v30 = vpop.f32.mrf.mxu1 }
 0x933   :  { %v2383_v34 = vpop.f32.mrf.mxu3  ;;  %v2408_v56 = vpop.f32.mrf.mxu0 }
 0x934   :  { %v2402_v35 = vadd.f32 %v2401_v26, %v2383_v34  ;;  %v2426_v31 = vpop.f32.mrf.mxu1  ;;  %v2437_v39 = vpop.f32.mrf.mxu2  ;;  %v3451_v56 = vld [vmem:[%s4538_s19] ss:$0 sm:$0xff] }
 0x936   :  { %v2420_v20 = vadd.f32 %v2419_v48, %v2402_v35 }
 0x938   :  { %v2438_v32 = vadd.f32 %v2437_v39, %v2420_v20  ;;  %v3452_v39 = vld [vmem:[%s4539_s20] ss:$0 sm:$0xff] }
 0x93a   :  { %v2446_v33 = vadd.f32 %v2438_v32, %v4457_v11 }
 0x93b   :  { %v2385_v40 = vpop.f32.mrf.mxu3 }
 0x93c   :  { %v2404_v41 = vadd.f32 %v2403_v5, %v2385_v40  ;;  %v2439_v27 = vpop.f32.mrf.mxu2  ;;  %v2449_v25 = vadd.f32 %v2446_v33, %v3833_v46 }
 0x93e   :  { %v2422_v36 = vadd.f32 %v2421_v12, %v2404_v41  ;;  %v2456_v42 = vadd.f32 %v3450_v57, %v2449_v25 }
 0x940   :  { %v2440_v43 = vadd.f32 %v2439_v27, %v2422_v36  ;;  %v2459_v44 = vsel %vm175_vm3, %v2456_v42, 0.0 }
 0x941   :  { %2460 = vadd.xlane.f32.xlu0 %v2459_v44 }
 0x942   :  { %v2447_v22 = vadd.f32 %v2440_v43, %v4475_v23 }
 0x943   :  { %v2388_v45 = vpop.f32.mrf.mxu3 }
 0x944   :  { %v2407_v50 = vadd.f32 %v2406_v51, %v2388_v45  ;;  %v2442_v11 = vpop.f32.mrf.mxu2  ;;  %v2450_v1 = vadd.f32 %v2447_v22, %v3835_v47 }
 0x946   :  { %v2425_v16 = vadd.f32 %v2424_v30, %v2407_v50  ;;  %v2457_v52 = vadd.f32 %v3450_v57, %v2450_v1 }
 0x948   :  { %v2443_v53 = vadd.f32 %v2442_v11, %v2425_v16  ;;  %v2462_v7 = vsel %vm175_vm3, %v2457_v52, 0.0 }
 0x949   :  { %2463 = vadd.xlane.f32.xlu1 %v2462_v7 }
 0x94a   :  { %v2448_v46 = vadd.f32 %v2443_v53, %v4478_v38 }
 0x94b   :  { %v2390_v21 = vpop.f32.mrf.mxu3 }
 0x94c   :  { %v2444_v58 = vpop.f32.mrf.mxu2  ;;  %v2451_v8 = vadd.f32 %v2448_v46, %v3851_v54 }
 0x94e   :  { %v2458_v59 = vadd.f32 %v3450_v57, %v2451_v8 }
 0x950   :  { %v2465_v23 = vsel %vm441_vm7, %v2458_v59, 0.0 }
 0x951   :  { %2466 = vadd.xlane.f32.xlu2 %v2465_v23 }
 0x9b4   :  { %v2461_v60 = vpop.xlane.xlu0 %2460 }
 0x9b5   :  { %v2468_v61 = vmul.f32 %v2461_v60, %v3695_v49 }
 0x9b7   :  { %v2471_v47 = vsub.f32 %v2456_v42, %v2468_v61 }
 0x9b9   :  { %v2474_v62 = vmul.f32 %v2471_v47, %v2471_v47 }
 0x9bb   :  { %v2477_v63 = vsel %vm175_vm3, %v2474_v62, 0.0 }
 0x9bc   :  { %2478 = vadd.xlane.f32.xlu0 %v2477_v63  ;;  %v2464_v0 = vpop.xlane.xlu1 %2463 }
 0x9bd   :  { %v2469_v4 = vmul.f32 %v2464_v0, %v3695_v49 }
 0x9bf   :  { %v2472_v38 = vsub.f32 %v2457_v52, %v2469_v4 }
 0x9c1   :  { %v2475_v6 = vmul.f32 %v2472_v38, %v2472_v38 }
 0x9c3   :  { %v2480_v9 = vsel %vm175_vm3, %v2475_v6, 0.0 }
 0x9c4   :  { %2481 = vadd.xlane.f32.xlu1 %v2480_v9  ;;  %v2467_v54 = vpop.xlane.xlu2 %2466 }
 0x9c5   :  { %v2470_v10 = vmul.f32 %v2467_v54, %v3695_v49 }
 0x9c7   :  { %v2473_v55 = vsub.f32 %v2458_v59, %v2470_v10 }
 0x9c9   :  { %v2476_v28 = vmul.f32 %v2473_v55, %v2473_v55 }
 0x9cb   :  { %v2483_v29 = vsel %vm441_vm7, %v2476_v28, 0.0 }
 0x9cc   :  { %2484 = vadd.xlane.f32.xlu2 %v2483_v29 }
 0xa2f   :  { %v2479_v15 = vpop.xlane.xlu0 %2478 }
 0xa30   :  { %v2486_v17 = vmul.f32 %v2479_v15, %v3695_v49 }
 0xa32   :  { %v2489_v13 = vadd.f32 1e-05, %v2486_v17 }
 0xa34   :  { %3473 = vrsqrt.f32 %v2489_v13  ;;  %vm2498_vm4 = vweird.f32 %v2489_v13 }
 0xa37   :  { %v2482_v2 = vpop.xlane.xlu1 %2481 }
 0xa38   :  { %v2487_v37 = vmul.f32 %v2482_v2, %v3695_v49 }
 0xa3a   :  { %v3474_v14 = vpop.eup %3473  ;;  %v2490_v3 = vadd.f32 1e-05, %v2487_v37 }
 0xa3b   :  { %v2493_v18 = vmul.f32 %v3474_v14, %v2489_v13  ;;  %vm2499_vm2 = vweird.f32 %v3474_v14 }
 0xa3c   :  { %3475 = vrsqrt.f32 %v2490_v3  ;;  %vm2500_vm5 = vmor %vm2498_vm4, %vm2499_vm2  ;;  %vm2508_vm8 = vweird.f32 %v2490_v3 }
 0xa3d   :  { %v2494_v19 = vmul.f32 %v3474_v14, %v2493_v18 }
 0xa3f   :  { %v2495_v24 = vmul.f32 0.5, %v2494_v19  ;;  %v2485_v26 = vpop.xlane.xlu2 %2484 }
 0xa40   :  { %v2488_v48 = vmul.f32 %v2485_v26, %v3695_v49 }
 0xa41   :  { %v2496_v5 = vsub.f32 1.5, %v2495_v24 }
 0xa42   :  { %v3476_v12 = vpop.eup %3475  ;;  %v2491_v51 = vadd.f32 1e-05, %v2488_v48 }
 0xa43   :  { %v2497_v30 = vmul.f32 %v3474_v14, %v2496_v5  ;;  %v2503_v34 = vmul.f32 %v3476_v12, %v2490_v3  ;;  %vm2509_vm6 = vweird.f32 %v3476_v12 }
 0xa44   :  { %3477 = vrsqrt.f32 %v2491_v51  ;;  %vm2510_vm9 = vmor %vm2508_vm8, %vm2509_vm6  ;;  %vm2518_vm11 = vweird.f32 %v2491_v51 }
 0xa45   :  { %v2501_v35 = vsel %vm2500_vm5, %v3474_v14, %v2497_v30  ;;  %v2504_v31 = vmul.f32 %v3476_v12, %v2503_v34 }
 0xa46   :  { %v2522_v49 = vmul.f32 %v2501_v35, %v2471_v47 }
 0xa47   :  { %v2505_v20 = vmul.f32 0.5, %v2504_v31 }
 0xa48   :  { %v2529_v32 = vmul.f32 %v3451_v56, %v2522_v49 }
 0xa49   :  { %v2506_v33 = vsub.f32 1.5, %v2505_v20 }
 0xa4a   :  { %v3478_v57 = vpop.eup %3477  ;;  %v2536_v40 = vadd.f32 %v3452_v39, %v2529_v32 }
 0xa4b   :  { %v2507_v41 = vmul.f32 %v3476_v12, %v2506_v33  ;;  %v2513_v27 = vmul.f32 %v3478_v57, %v2491_v51  ;;  %vm2519_vm10 = vweird.f32 %v3478_v57 }
 0xa4c   :  { %2539 = vst.msk [vmem:[%s4540_s21] sm:$0xff] %vm175_vm3, %v2536_v40  ;;  %vm2520_vm12 = vmor %vm2518_vm11, %vm2519_vm10 }
 0xa4d   :  { %v2511_v25 = vsel %vm2510_vm9, %v3476_v12, %v2507_v41  ;;  %v2514_v36 = vmul.f32 %v3478_v57, %v2513_v27 }
 0xa4e   :  { %v2523_v42 = vmul.f32 %v2511_v25, %v2472_v38 }
 0xa4f   :  { %v2515_v43 = vmul.f32 0.5, %v2514_v36 }
 0xa50   :  { %v2530_v44 = vmul.f32 %v3451_v56, %v2523_v42 }
 0xa51   :  { %v2516_v22 = vsub.f32 1.5, %v2515_v43 }
 0xa52   :  { %v2537_v45 = vadd.f32 %v3452_v39, %v2530_v44 }
 0xa53   :  { %v2517_v50 = vmul.f32 %v3478_v57, %v2516_v22 }
 0xa54   :  { %2540 = vst.msk [vmem:[%s4540_s21 + $0x8] sm:$0xff] %vm175_vm3, %v2537_v45 }
 0xa55   :  { %v2521_v11 = vsel %vm2520_vm12, %v3478_v57, %v2517_v50 }
 0xa56   :  { %v2524_v1 = vmul.f32 %v2521_v11, %v2473_v55 }
 0xa58   :  { %v2531_v16 = vmul.f32 %v3451_v56, %v2524_v1 }
 0xa5a   :  { %v2538_v52 = vadd.f32 %v3452_v39, %v2531_v16 }
 0xa5c   :  { %2541 = vst.msk [vmem:[%s4540_s21 + $0x10] sm:$0xf] %vm441_vm7, %v2538_v52 }

</bundles_post_ra>
